<compile_context>
chip_gen: v5e
topology: v5e:2x2
jax: 0.10.0
libtpu: 0.0.40
codegen_flags: <defaults>
</compile_context>

<pallas_src>
import math
from functools import partial

import numpy as np
import jax
import jax.numpy as jnp
from jax import lax
from jax.experimental import pallas as pl
from jax.experimental.pallas import tpu as pltpu


def _round_up(x, m):
    return ((x + m - 1) // m) * m


# ---------------------------------------------------------------------------
# Pallas kernels
# ---------------------------------------------------------------------------

def _pick_tiles(M, K, N):
    """Tile sizes for the fused matmul kernel (bf16 operands, f32 accumulation)."""
    if K > 1024:                        # K grid axis only for very wide contractions
        tk = 512
        Kp = _round_up(K, tk)
    else:                               # single full-K block, pad only to bf16-friendly 16
        Kp = _round_up(K, 16)
        tk = Kp
    Mp = _round_up(M, 8)
    if Mp >= 2048:
        tm = 1024                       # big tiles amortize per-step overhead; >=2 tiles for 2 TCs
    elif Mp >= 1024:
        tm = 512
    else:
        tm = Mp

    def footprint(t):                   # double-buffered A/W/res/out blocks + f32 accumulator
        return 2 * (t * tk * 2 + tk * N * 2 + 2 * t * N * 4) + t * N * 4

    while tm > 64 and footprint(tm) > 12 * 1024 * 1024:
        tm //= 2
    Mp = _round_up(Mp, tm)
    return Mp, Kp, tm, tk


@partial(jax.jit, static_argnames=("act", "res_mode", "tm", "tk"))
def _mm_call(a_p, w_p, s_p, b_p, r_p, *, act, res_mode, tm, tk):
    Mp, Kp = a_p.shape
    Np = w_p.shape[1]
    nk = Kp // tk
    has_res = r_p is not None

    def epilogue(acc, s, b, r):
        y = acc * s + b
        if act == "relu":
            y = jnp.maximum(y, 0.0)
        if res_mode == "add":
            y = y + r
        elif res_mode == "add_relu":
            y = jnp.maximum(y + r, 0.0)
        return y

    if nk == 1:
        # Fast path (every layer in this config): single K block, 1-D grid over M tiles,
        # no scratch accumulator and no pl.when predicates.
        def kernel(*refs):
            if has_res:
                a_ref, w_ref, s_ref, b_ref, r_ref, o_ref = refs
                r = r_ref[...]
            else:
                a_ref, w_ref, s_ref, b_ref, o_ref = refs
                r = None
            acc = jnp.dot(a_ref[...], w_ref[...], preferred_element_type=jnp.float32)
            o_ref[...] = epilogue(acc, s_ref[...], b_ref[...], r)

        in_specs = [
            pl.BlockSpec((tm, tk), lambda i: (i, 0)),
            pl.BlockSpec((tk, Np), lambda i: (0, 0)),
            pl.BlockSpec((1, Np), lambda i: (0, 0)),
            pl.BlockSpec((1, Np), lambda i: (0, 0)),
        ]
        args = [a_p, w_p, s_p, b_p]
        if has_res:
            in_specs.append(pl.BlockSpec((tm, Np), lambda i: (i, 0)))
            args.append(r_p)

        return pl.pallas_call(
            kernel,
            out_shape=jax.ShapeDtypeStruct((Mp, Np), jnp.float32),
            grid=(Mp // tm,),
            in_specs=in_specs,
            out_specs=pl.BlockSpec((tm, Np), lambda i: (i, 0)),
            compiler_params=pltpu.CompilerParams(
                dimension_semantics=("parallel",),
                vmem_limit_bytes=32 * 1024 * 1024),
        )(*args)

    # K-tiled path (rare): (M, K) grid with f32 VMEM accumulator, reduction axis last.
    def kernel(*refs):
        if has_res:
            a_ref, w_ref, s_ref, b_ref, r_ref, o_ref, acc_ref = refs
        else:
            a_ref, w_ref, s_ref, b_ref, o_ref, acc_ref = refs
            r_ref = None
        k = pl.program_id(1)

        @pl.when(k == 0)
        def _():
            acc_ref[...] = jnp.zeros_like(acc_ref)

        acc_ref[...] += jnp.dot(a_ref[...], w_ref[...],
                                preferred_element_type=jnp.float32)

        @pl.when(k == nk - 1)
        def _():
            r = r_ref[...] if has_res else None
            o_ref[...] = epilogue(acc_ref[...], s_ref[...], b_ref[...], r)

    in_specs = [
        pl.BlockSpec((tm, tk), lambda i, k: (i, k)),
        pl.BlockSpec((tk, Np), lambda i, k: (k, 0)),
        pl.BlockSpec((1, Np), lambda i, k: (0, 0)),
        pl.BlockSpec((1, Np), lambda i, k: (0, 0)),
    ]
    args = [a_p, w_p, s_p, b_p]
    if has_res:
        in_specs.append(pl.BlockSpec((tm, Np), lambda i, k: (i, 0)))
        args.append(r_p)

    return pl.pallas_call(
        kernel,
        out_shape=jax.ShapeDtypeStruct((Mp, Np), jnp.float32),
        grid_spec=pltpu.PrefetchScalarGridSpec(
            num_scalar_prefetch=0,
            grid=(Mp // tm, nk),
            in_specs=in_specs,
            out_specs=pl.BlockSpec((tm, Np), lambda i, k: (i, 0)),
            scratch_shapes=[pltpu.VMEM((tm, Np), jnp.float32)],
        ),
        compiler_params=pltpu.CompilerParams(
            dimension_semantics=("parallel", "arbitrary"),
            vmem_limit_bytes=32 * 1024 * 1024),
    )(*args)


def matmul_scale_bias_act(a, w, scale, bias, act=None, residual=None, res_mode="none"):
    """act((a @ w) * scale + bias) [+ residual [, relu]] : one fused Pallas MXU kernel.

    bf16 operands / f32 accumulation; scale/bias broadcast over rows; the optional
    residual (same (M, N) shape as the output) is fused into the epilogue.
    """
    M, K = a.shape
    N = w.shape[1]
    if residual is None:
        res_mode = "none"
    Mp, Kp, tm, tk = _pick_tiles(M, K, N)

    a_p = a.astype(jnp.bfloat16)
    if (Mp, Kp) != (M, K):
        a_p = jnp.pad(a_p, ((0, Mp - M), (0, Kp - K)))
    w_p = w.astype(jnp.bfloat16)
    if Kp != K:
        w_p = jnp.pad(w_p, ((0, Kp - K), (0, 0)))
    s_p = scale.astype(jnp.float32).reshape(1, N)
    b_p = bias.astype(jnp.float32).reshape(1, N)
    r_p = None
    if residual is not None:
        r_p = residual.reshape(M, N).astype(jnp.float32)
        if Mp != M:
            r_p = jnp.pad(r_p, ((0, Mp - M), (0, 0)))

    out = _mm_call(a_p, w_p, s_p, b_p, r_p, act=act, res_mode=res_mode, tm=tm, tk=tk)
    return out[:M] if Mp != M else out


@partial(jax.jit, static_argnames=("mode", "tr"))
def _ew_call(x_p, y_p, *, mode, tr):
    rows, cols = x_p.shape

    def kernel(a_ref, b_ref, o_ref):
        v = a_ref[...] + b_ref[...]
        if mode == "add_relu":
            v = jnp.maximum(v, 0.0)
        o_ref[...] = v

    return pl.pallas_call(
        kernel,
        out_shape=jax.ShapeDtypeStruct((rows, cols), jnp.float32),
        grid=(rows // tr,),
        in_specs=[pl.BlockSpec((tr, cols), lambda i: (i, 0))] * 2,
        out_specs=pl.BlockSpec((tr, cols), lambda i: (i, 0)),
        compiler_params=pltpu.CompilerParams(
            dimension_semantics=("parallel",),
            vmem_limit_bytes=32 * 1024 * 1024),
    )(x_p, y_p)


def _ew2(x, y, mode):
    shape = x.shape
    L = int(np.prod(shape))
    lanes = 512                                  # lane-dense blocks (4 x 128)
    rows = -(-L // lanes)
    tr = min(_round_up(rows, 8), 256)
    rows_p = _round_up(rows, tr)
    Lp = rows_p * lanes
    xf = jnp.pad(x.reshape(-1).astype(jnp.float32), (0, Lp - L)).reshape(rows_p, lanes)
    yf = jnp.pad(y.reshape(-1).astype(jnp.float32), (0, Lp - L)).reshape(rows_p, lanes)
    out = _ew_call(xf, yf, mode=mode, tr=tr)
    return out.reshape(-1)[:L].reshape(shape)


def ew_add(x, y):
    return _ew2(x, y, "add")


@partial(jax.jit, static_argnames=("tr",))
def _softmax_call(x_p, *, tr):
    rows, cols = x_p.shape

    def kernel(x_ref, o_ref):
        v = x_ref[...]
        m = jnp.max(v, axis=-1, keepdims=True)
        e = jnp.exp(v - m)
        o_ref[...] = e / jnp.sum(e, axis=-1, keepdims=True)

    return pl.pallas_call(
        kernel,
        out_shape=jax.ShapeDtypeStruct((rows, cols), jnp.float32),
        grid=(rows // tr,),
        in_specs=[pl.BlockSpec((tr, cols), lambda i: (i, 0))],
        out_specs=pl.BlockSpec((tr, cols), lambda i: (i, 0)),
        compiler_params=pltpu.CompilerParams(
            dimension_semantics=("parallel",),
            vmem_limit_bytes=32 * 1024 * 1024),
    )(x_p)


def softmax_lastdim(x2d):
    M, C = x2d.shape
    tr = min(_round_up(M, 8), 512)
    Mp = _round_up(_round_up(M, 8), tr)
    xp = x2d.astype(jnp.float32)
    if Mp != M:
        xp = jnp.pad(xp, ((0, Mp - M), (0, 0)))   # padded rows give finite junk, sliced off
    return _softmax_call(xp, tr=tr)[:M]


# ---------------------------------------------------------------------------
# Convolution glue (im2col in bf16) built on the fused Pallas matmul kernel
# ---------------------------------------------------------------------------

def _im2col(x, kh, kw, stride, padding, dilation):
    n, h, w, c = x.shape
    sh, sw = stride
    ph, pw = padding
    dh, dw = dilation
    ho = (h + 2 * ph - dh * (kh - 1) - 1) // sh + 1
    wo = (w + 2 * pw - dw * (kw - 1) - 1) // sw + 1
    xp = jnp.pad(x, ((0, 0), (ph, ph), (pw, pw), (0, 0)))
    cols = []
    for i in range(kh):
        for j in range(kw):
            patch = xp[:, i * dh::sh, :, :][:, :ho, :, :]
            patch = patch[:, :, j * dw::sw, :][:, :, :wo, :]
            cols.append(patch)
    patches = jnp.stack(cols, axis=3)  # [n, ho, wo, kh*kw, c]
    return patches.reshape(n * ho * wo, kh * kw * c), (n, ho, wo)


def conv2d(x, w, *, stride=(1, 1), padding=(0, 0), dilation=(1, 1),
           scale=None, bias=None, act=None, residual=None, res_mode="none"):
    kh, kw, cin, cout = w.shape
    xb = x.astype(jnp.bfloat16)
    if kh == 1 and kw == 1 and stride == (1, 1) and padding == (0, 0):
        n, h, w_sp, _ = x.shape
        a = xb.reshape(n * h * w_sp, cin)          # 1x1 conv: no im2col expansion
        ho, wo = h, w_sp
    else:
        a, (n, ho, wo) = _im2col(xb, kh, kw, stride, padding, dilation)
    wm = w.reshape(kh * kw * cin, cout)
    if scale is None:
        scale = jnp.ones((cout,), jnp.float32)
    if bias is None:
        bias = jnp.zeros((cout,), jnp.float32)
    r2d = None
    if residual is not None:
        r2d = residual.reshape(n * ho * wo, cout)
    y = matmul_scale_bias_act(a, wm, scale, bias, act=act, residual=r2d, res_mode=res_mode)
    return y.reshape(n, ho, wo, cout)


def conv_bn(x, w, bn, act=None, **kw):
    return conv2d(x, w, scale=bn["scale"], bias=bn["shift"], act=act, **kw)


def conv_bias_bn(x, w, b, bn, act=None, **kw):
    return conv2d(x, w, scale=bn["scale"], bias=b * bn["scale"] + bn["shift"], act=act, **kw)


def _subpixel_deconv_weight(w):
    """Assemble ConvTranspose2d(k=3,s=2,p=1,op=1) as ONE dense matmul weight.

    `w` is the equivalent direct-conv (pre-flipped) HWIO kernel.  Input slots along K are
    [x[i,j], x[i,j+1], x[i+1,j], x[i+1,j+1]]; output parity blocks along N are
    [(0,0),(0,1),(1,0),(1,1)] of the 2x up-sampled map.
    """
    _, _, cin, cout = w.shape
    wb = jnp.zeros((4 * cin, 4 * cout), jnp.float32)
    taps = {  # (input slot, output parity) -> kernel tap (ky, kx)
        (0, 0): (1, 1),
        (0, 1): (1, 0), (1, 1): (1, 2),
        (0, 2): (0, 1), (2, 2): (2, 1),
        (0, 3): (0, 0), (1, 3): (0, 2), (2, 3): (2, 0), (3, 3): (2, 2),
    }
    for (slot, par), (ky, kx) in taps.items():
        wb = wb.at[slot * cin:(slot + 1) * cin, par * cout:(par + 1) * cout].set(w[ky, kx])
    return wb


def conv_transpose2d_s2(x, wbig, bn, act):
    """Sub-pixel decomposition of ConvTranspose2d(k=3, stride=2, padding=1, output_padding=1)."""
    n, h, w_, c = x.shape
    cout = wbig.shape[1] // 4
    xp = jnp.pad(x, ((0, 0), (0, 1), (0, 1), (0, 0))).astype(jnp.bfloat16)
    a = jnp.concatenate([
        xp[:, :h, :w_, :],            # x[i, j]
        xp[:, :h, 1:w_ + 1, :],       # x[i, j+1]
        xp[:, 1:h + 1, :w_, :],       # x[i+1, j]
        xp[:, 1:h + 1, 1:w_ + 1, :],  # x[i+1, j+1]
    ], axis=-1).reshape(n * h * w_, 4 * c)
    scale = jnp.tile(bn["scale"], 4)
    bias = jnp.tile(bn["shift"], 4)
    y = matmul_scale_bias_act(a, wbig, scale, bias, act=act)      # (n*h*w, 4*cout)
    y = y.reshape(n, h, w_, 2, 2, cout)
    return jnp.transpose(y, (0, 1, 3, 2, 4, 5)).reshape(n, 2 * h, 2 * w_, cout)


def linear(x, p, act=None):
    fout = p["w"].shape[1]
    return matmul_scale_bias_act(x, p["w"], jnp.ones((fout,), jnp.float32), p["b"], act)


# ---------------------------------------------------------------------------
# Non-Pallas glue: pooling / bilinear resize
# ---------------------------------------------------------------------------
# TODO(synk): pooling & bilinear interpolation kept as lax/jnp glue (memory-bound, not hot path;
#             fused by the top-level jit).

def max_pool2d(x, k, s, p):
    return lax.reduce_window(x, -jnp.inf, lax.max, (1, k, k, 1), (1, s, s, 1),
                             ((0, 0), (p, p), (p, p), (0, 0)))


def avg_pool2d(x, k, s):
    summed = lax.reduce_window(x, 0.0, lax.add, (1, k, k, 1), (1, s, s, 1),
                               ((0, 0), (0, 0), (0, 0), (0, 0)))
    return summed / float(k * k)


def bilinear_resize(x, out_h, out_w):
    # matches F.interpolate(mode='bilinear', align_corners=False)
    n, h, w, c = x.shape

    def grid(out_sz, in_sz):
        src = (jnp.arange(out_sz, dtype=jnp.float32) + 0.5) * (in_sz / out_sz) - 0.5
        src = jnp.maximum(src, 0.0)
        i0 = jnp.minimum(jnp.floor(src).astype(jnp.int32), in_sz - 1)
        i1 = jnp.minimum(i0 + 1, in_sz - 1)
        return i0, i1, src - i0.astype(jnp.float32)

    y0, y1, fy = grid(out_h, h)
    x0, x1, fx = grid(out_w, w)
    fy = fy[None, :, None, None]
    fx = fx[None, None, :, None]
    top, bot = x[:, y0, :, :], x[:, y1, :, :]
    tl, tr = top[:, :, x0, :], top[:, :, x1, :]
    bl, br = bot[:, :, x0, :], bot[:, :, x1, :]
    t = tl * (1.0 - fx) + tr * fx
    b = bl * (1.0 - fx) + br * fx
    return t * (1.0 - fy) + b * fy


# ---------------------------------------------------------------------------
# Deterministic parameter initialization
# ---------------------------------------------------------------------------

class ParamInit:
    def __init__(self, seed):
        self._key = jax.random.PRNGKey(seed)

    def _next(self):
        self._key, k = jax.random.split(self._key)
        return k

    def conv(self, kh, kw, cin, cout):
        std = math.sqrt(2.0 / (kh * kw * cin))
        return std * jax.random.normal(self._next(), (kh, kw, cin, cout), jnp.float32)

    def conv_uniform(self, kh, kw, cin, cout, bound):
        return jax.random.uniform(self._next(), (kh, kw, cin, cout), jnp.float32, -bound, bound)

    def bias(self, c, bound):
        return jax.random.uniform(self._next(), (c,), jnp.float32, -bound, bound)

    def bn(self, c, eps=1e-5):
        gamma = 1.0 + 0.1 * jax.random.normal(self._next(), (c,), jnp.float32)
        beta = 0.1 * jax.random.normal(self._next(), (c,), jnp.float32)
        # inference-mode BN (running_mean=0, running_var=1) folded into scale/shift
        return {"scale": gamma / jnp.sqrt(1.0 + eps), "shift": beta}

    def linear(self, fin, fout):
        bound = 1.0 / math.sqrt(fin)
        return {"w": jax.random.uniform(self._next(), (fin, fout), jnp.float32, -bound, bound),
                "b": jax.random.uniform(self._next(), (fout,), jnp.float32, -bound, bound)}


# ---------------------------------------------------------------------------
# Backbone: Bottleneck ResNet, replace_stride_with_dilation=[False, True, True],
# truncated at layer3 (IntermediateLayerGetter(return_layers={'layer3': 'out'})).
# Width/depth reduced for this synthetic run.
# ---------------------------------------------------------------------------

EXPANSION = 4


def make_bottleneck(init, inplanes, planes, stride, dilation, downsample):
    p = {
        "conv1": init.conv(1, 1, inplanes, planes), "bn1": init.bn(planes),
        "conv2": init.conv(3, 3, planes, planes), "bn2": init.bn(planes),
        "conv3": init.conv(1, 1, planes, planes * EXPANSION), "bn3": init.bn(planes * EXPANSION),
        "stride": stride, "dilation": dilation,
    }
    if downsample:
        p["down_conv"] = init.conv(1, 1, inplanes, planes * EXPANSION)
        p["down_bn"] = init.bn(planes * EXPANSION)
    return p


def bottleneck_forward(p, x):
    s, d = p["stride"], p["dilation"]
    out = conv_bn(x, p["conv1"], p["bn1"], act="relu")
    out = conv_bn(out, p["conv2"], p["bn2"], act="relu",
                  stride=(s, s), padding=(d, d), dilation=(d, d))
    if "down_conv" in p:
        identity = conv_bn(x, p["down_conv"], p["down_bn"], act=None, stride=(s, s))
    else:
        identity = x
    # relu(conv3_bn(out) + identity) fused into the conv3 matmul epilogue
    return conv_bn(out, p["conv3"], p["bn3"], act=None, residual=identity, res_mode="add_relu")


def make_backbone(init, stem_width, layer_planes, layer_blocks, strides, dilate_flags):
    params = {"stem_conv": init.conv(7, 7, 3, stem_width), "stem_bn": init.bn(stem_width)}
    state = {"inplanes": stem_width, "dilation": 1}
    layers = []
    for planes, blocks, stride, dilate in zip(layer_planes, layer_blocks, strides, dilate_flags):
        prev_dil = state["dilation"]
        if dilate:
            state["dilation"] *= stride
            stride = 1
        downsample = (stride != 1) or (state["inplanes"] != planes * EXPANSION)
        blk = [make_bottleneck(init, state["inplanes"], planes, stride, prev_dil, downsample)]
        state["inplanes"] = planes * EXPANSION
        for _ in range(1, blocks):
            blk.append(make_bottleneck(init, state["inplanes"], planes, 1, state["dilation"], False))
        layers.append(blk)
    params["layers"] = layers
    params["out_channels"] = state["inplanes"]
    return params


def backbone_forward(p, x):
    x = conv_bn(x, p["stem_conv"], p["stem_bn"], act="relu", stride=(2, 2), padding=(3, 3))
    x = max_pool2d(x, 3, 2, 1)
    for blk_list in p["layers"]:
        for blk in blk_list:
            x = bottleneck_forward(blk, x)
    return {"out": x}


# ---------------------------------------------------------------------------
# RESAReducer / RESA / BUSD / EDLaneExist
# ---------------------------------------------------------------------------

def make_resa(init, channels, iteration):
    bound = math.sqrt(2.0 / (channels * 9 * 5))
    convs = {}
    for i in range(iteration):
        convs[f"d{i}"] = init.conv_uniform(1, 9, channels, channels, bound)
        convs[f"u{i}"] = init.conv_uniform(1, 9, channels, channels, bound)
        convs[f"r{i}"] = init.conv_uniform(9, 1, channels, channels, bound)
        convs[f"l{i}"] = init.conv_uniform(9, 1, channels, channels, bound)
    return convs


def resa_forward(p, x, iteration, alpha=2.0):
    n, h, w, c = x.shape
    alpha_scale = alpha * jnp.ones((c,), jnp.float32)   # alpha*relu(z) == relu(alpha*z), alpha > 0
    zero_bias = jnp.zeros((c,), jnp.float32)
    for direction, sign in (("d", 1), ("u", -1)):
        for i in range(iteration):
            idx = (np.arange(h) + sign * (h // 2 ** (iteration - i))) % h
            # x = x + relu(alpha * conv(shift(x))) : residual add fused into the matmul epilogue
            x = conv2d(x[:, idx, :, :], p[f"{direction}{i}"], padding=(0, 4),
                       scale=alpha_scale, bias=zero_bias, act="relu",
                       residual=x, res_mode="add")
    for direction, sign in (("r", 1), ("l", -1)):
        for i in range(iteration):
            idx = (np.arange(w) + sign * (w // 2 ** (iteration - i))) % w
            x = conv2d(x[:, :, idx, :], p[f"{direction}{i}"], padding=(4, 0),
                       scale=alpha_scale, bias=zero_bias, act="relu",
                       residual=x, res_mode="add")
    return x


def make_non_bottleneck_1d(init, ch, dilation):
    bb = 1.0 / math.sqrt(ch * 3)
    return {
        "c31_1": init.conv(3, 1, ch, ch), "b31_1": init.bias(ch, bb),
        "c13_1": init.conv(1, 3, ch, ch), "b13_1": init.bias(ch, bb),
        "bn1": init.bn(ch, eps=1e-3),
        "c31_2": init.conv(3, 1, ch, ch), "b31_2": init.bias(ch, bb),
        "c13_2": init.conv(1, 3, ch, ch), "b13_2": init.bias(ch, bb),
        "bn2": init.bn(ch, eps=1e-3),
        "dilation": dilation,
    }


def non_bottleneck_1d_forward(p, x):
    d = p["dilation"]
    out = conv2d(x, p["c31_1"], padding=(1, 0), bias=p["b31_1"], act="relu")
    out = conv_bias_bn(out, p["c13_1"], p["b13_1"], p["bn1"], act="relu", padding=(0, 1))
    out = conv2d(out, p["c31_2"], padding=(d, 0), dilation=(d, 1), bias=p["b31_2"], act="relu")
    # Dropout2d(p=0) is identity; relu(conv + x) fused into the final matmul epilogue
    return conv_bias_bn(out, p["c13_2"], p["b13_2"], p["bn2"], act=None,
                        padding=(0, d), dilation=(1, d), residual=x, res_mode="add_relu")


def make_bub(init, cin, cout):  # BilateralUpsamplerBlock
    w = init.conv(3, 3, cin, cout)  # ConvTranspose2d kernel stored as equivalent direct conv
    return {
        "deconv_big": _subpixel_deconv_weight(w),   # (4*cin, 4*cout) sub-pixel matmul weight
        "bn1": init.bn(cout, eps=1e-3),
        "follows": [make_non_bottleneck_1d(init, cout, 1) for _ in range(2)],
        "interp_conv": init.conv(1, 1, cin, cout),
        "interp_bn": init.bn(cout, eps=1e-3),
    }


def bub_forward(p, x):
    out = conv_transpose2d_s2(x, p["deconv_big"], p["bn1"], act="relu")
    for f in p["follows"]:
        out = non_bottleneck_1d_forward(f, out)
    interp = conv_bn(x, p["interp_conv"], p["interp_bn"], act="relu")
    interp = bilinear_resize(interp, out.shape[1], out.shape[2])
    return ew_add(out, interp)


def make_busd(init, in_channels, num_classes):
    base = in_channels // 8
    return {
        "blocks": [make_bub(init, in_channels // 2 ** i, in_channels // 2 ** (i + 1)) for i in range(3)],
        "cls_w": init.conv(1, 1, base, num_classes),
        "cls_b": init.bias(num_classes, 1.0 / math.sqrt(base)),
    }


def busd_forward(p, x):
    for blk in p["blocks"]:
        x = bub_forward(blk, x)
    return conv2d(x, p["cls_w"], bias=p["cls_b"], act=None)


def make_lane_exist(init, in_channels, num_output, flattened_size, mid_channels, linear_mid):
    return {
        "conv1": init.conv(3, 3, in_channels, mid_channels),
        "bn1": init.bn(mid_channels, eps=1e-3),
        "conv2": init.conv(1, 1, mid_channels, num_output + 1),
        "conv2_b": init.bias(num_output + 1, 1.0 / math.sqrt(mid_channels)),
        "fc1": init.linear(flattened_size, linear_mid),
        "fc2": init.linear(linear_mid, num_output),
    }


def lane_exist_forward(p, x):
    out = conv_bn(x, p["conv1"], p["bn1"], act="relu", padding=(4, 4), dilation=(4, 4))
    # Dropout2d -> identity (inference)
    out = conv2d(out, p["conv2"], bias=p["conv2_b"], act=None)
    n, h, w, c = out.shape
    out = softmax_lastdim(out.reshape(n * h * w, c)).reshape(n, h, w, c)  # softmax over channels
    out = avg_pool2d(out, 2, 2)
    out = jnp.transpose(out, (0, 3, 1, 2)).reshape(n, -1)  # PyTorch NCHW flatten order
    out = linear(out, p["fc1"], act="relu")
    return linear(out, p["fc2"], act=None)


# ---------------------------------------------------------------------------
# RESANet
# ---------------------------------------------------------------------------

def make_resanet(init, *, num_classes, channel_reduce, flattened_size,
                 stem_width, layer_planes, layer_blocks, resa_iteration):
    backbone = make_backbone(init, stem_width, layer_planes, layer_blocks,
                             strides=(1, 2, 2), dilate_flags=(False, False, True))
    in_channels = backbone["out_channels"]
    return {
        "backbone": backbone,
        "reducer": {"conv": init.conv(1, 1, in_channels, channel_reduce),
                    "bn": init.bn(channel_reduce)},
        "resa": make_resa(init, channel_reduce, resa_iteration),
        "resa_iteration": resa_iteration,
        "busd": make_busd(init, channel_reduce, num_classes),
        "lane": make_lane_exist(init, channel_reduce, num_classes - 1, flattened_size,
                                mid_channels=max(channel_reduce // 4, 4), linear_mid=32),
    }


def resanet_forward(params, x_nchw):
    x = jnp.transpose(x_nchw, (0, 2, 3, 1))                     # NCHW -> NHWC
    x = backbone_forward(params["backbone"], x)["out"]          # layer3 feature (stride 8)
    x = conv_bn(x, params["reducer"]["conv"], params["reducer"]["bn"], act="relu")
    x = resa_forward(params["resa"], x, params["resa_iteration"], alpha=2.0)
    seg = busd_forward(params["busd"], x)                       # NHWC logits
    lane = lane_exist_forward(params["lane"], x)
    return {"out": jnp.transpose(seg, (0, 3, 1, 2)), "lane": lane}


# ---------------------------------------------------------------------------
# Driver
# ---------------------------------------------------------------------------

if __name__ == "__main__":
    # Small, structurally faithful configuration (widths/depths scaled down).
    N, C_IN, H, W = 2, 3, 64, 64
    num_classes = 5                  # 4 lanes + background
    channel_reduce = 32              # RESAReducer output channels (128 in the paper)
    resa_iteration = 3               # RESA default 5, reduced for the 8x8 feature map
    feat_h, feat_w = H // 8, W // 8  # backbone output stride 8
    flattened_size = num_classes * (feat_h // 2) * (feat_w // 2)

    init = ParamInit(seed=42)
    params = make_resanet(
        init,
        num_classes=num_classes,
        channel_reduce=channel_reduce,
        flattened_size=flattened_size,
        stem_width=4,
        layer_planes=(4, 8, 16),     # bottleneck expansion 4 -> layer3 outputs 64 channels
        layer_blocks=(1, 1, 2),
        resa_iteration=resa_iteration,
    )

    x = jax.random.normal(jax.random.PRNGKey(0), (N, C_IN, H, W), jnp.float32)

    # Whole-forward jit: params closed over as constants so Python-int layer configs stay static;
    # all im2col / pad / pooling / resize glue compiles into one program around the Pallas calls.
    forward_jit = jax.jit(partial(resanet_forward, params))

    res = forward_jit(x)
    jax.block_until_ready(res)

    assert res["out"].shape == (N, num_classes, H, W), res["out"].shape
    assert res["lane"].shape == (N, num_classes - 1), res["lane"].shape
    assert bool(jnp.all(jnp.isfinite(res["out"])))
    assert bool(jnp.all(jnp.isfinite(res["lane"])))
    print("KERNEL_OK")
</pallas_src>

<mosaic_0001>
module attributes {stable_mosaic.version = 11 : i64} {
  func.func @kernel(%arg0: i32, %arg1: memref<1024x160xbf16, #tpu.memory_space<vmem>>, %arg2: memref<160x4xbf16, #tpu.memory_space<vmem>>, %arg3: memref<1x4xf32, #tpu.memory_space<vmem>>, %arg4: memref<1x4xf32, #tpu.memory_space<vmem>>, %arg5: memref<1024x4xf32, #tpu.memory_space<vmem>>) attributes {dimension_semantics = [#tpu.dimension_semantics<parallel>], iteration_bounds = array<i64: 2>, scalar_prefetch = 0 : i64, scratch_operands = 0 : i64, tpu.core_type = #tpu.core_type<tc>, window_params = [{transform_indices = @transform_0, window_bounds = array<i64: 1024, 160>}, {pipeline_mode = #tpu.pipeline_mode<synchronous>, transform_indices = @transform_1, window_bounds = array<i64: 160, 4>}, {pipeline_mode = #tpu.pipeline_mode<synchronous>, transform_indices = @transform_2, window_bounds = array<i64: 1, 4>}, {pipeline_mode = #tpu.pipeline_mode<synchronous>, transform_indices = @transform_3, window_bounds = array<i64: 1, 4>}, {transform_indices = @transform_4, window_bounds = array<i64: 1024, 4>}]} {
    %c0 = arith.constant 0 : index
    %c0_0 = arith.constant 0 : index
    %0 = vector.load %arg1[%c0, %c0_0] : memref<1024x160xbf16, #tpu.memory_space<vmem>>, vector<1024x160xbf16>
    %c0_1 = arith.constant 0 : index
    %c0_2 = arith.constant 0 : index
    %1 = vector.load %arg2[%c0_1, %c0_2] : memref<160x4xbf16, #tpu.memory_space<vmem>>, vector<160x4xbf16>
    %cst = arith.constant dense<0.000000e+00> : vector<1024x4xf32>
    %2 = tpu.matmul %0, %1, %cst {dimension_numbers = #tpu.dot_dimension_numbers<[1], [0], [0], [1], [0, 0, 1, 1], [], []>} : vector<1024x160xbf16>, vector<160x4xbf16>, vector<1024x4xf32> -> vector<1024x4xf32>
    %c0_3 = arith.constant 0 : index
    %c0_4 = arith.constant 0 : index
    %3 = vector.load %arg3[%c0_3, %c0_4] : memref<1x4xf32, #tpu.memory_space<vmem>>, vector<1x4xf32>
    %c0_5 = arith.constant 0 : index
    %c0_6 = arith.constant 0 : index
    %4 = vector.load %arg4[%c0_5, %c0_6] : memref<1x4xf32, #tpu.memory_space<vmem>>, vector<1x4xf32>
    %5 = vector.broadcast %3 : vector<1x4xf32> to vector<1024x4xf32>
    %6 = arith.mulf %2, %5 : vector<1024x4xf32>
    %7 = vector.broadcast %4 : vector<1x4xf32> to vector<1024x4xf32>
    %8 = arith.addf %6, %7 : vector<1024x4xf32>
    %cst_7 = arith.constant 0.000000e+00 : f32
    %9 = vector.broadcast %cst_7 : f32 to vector<1024x4xf32>
    %10 = arith.maximumf %8, %9 : vector<1024x4xf32>
    %c0_8 = arith.constant 0 : index
    %c0_9 = arith.constant 0 : index
    %11 = vector.load %arg5[%c0_8, %c0_9] : memref<1024x4xf32, #tpu.memory_space<vmem>>, vector<1024x4xf32>
    tpu.vector_store %arg5[%c0_8, %c0_9], %10 {strides = array<i32>} : memref<1024x4xf32, #tpu.memory_space<vmem>>, vector<1024x4xf32>,
    return
  }
  func.func @transform_0(%arg0: i32) -> (i32, i32) {
    %c0_i32 = arith.constant 0 : i32
    %c0_i32_0 = arith.constant 0 : i32
    return %arg0, %c0_i32 : i32, i32
  }
  func.func @transform_1(%arg0: i32) -> (i32, i32) {
    %c0_i32 = arith.constant 0 : i32
    %c0_i32_0 = arith.constant 0 : i32
    %c0_i32_1 = arith.constant 0 : i32
    return %c0_i32, %c0_i32_0 : i32, i32
  }
  func.func @transform_2(%arg0: i32) -> (i32, i32) {
    %c0_i32 = arith.constant 0 : i32
    %c0_i32_0 = arith.constant 0 : i32
    %c0_i32_1 = arith.constant 0 : i32
    return %c0_i32, %c0_i32_0 : i32, i32
  }
  func.func @transform_3(%arg0: i32) -> (i32, i32) {
    %c0_i32 = arith.constant 0 : i32
    %c0_i32_0 = arith.constant 0 : i32
    %c0_i32_1 = arith.constant 0 : i32
    return %c0_i32, %c0_i32_0 : i32, i32
  }
  func.func @transform_4(%arg0: i32) -> (i32, i32) {
    %c0_i32 = arith.constant 0 : i32
    %c0_i32_0 = arith.constant 0 : i32
    return %arg0, %c0_i32 : i32, i32
  }
}

</mosaic_0001>

<bundles_post_ra>
// kernel: _mm_call.1
= control target key start
LH: loop header
LB: loop body
LE: loop exit
PB: predicated region body
PF: predicated region fallthrough
CT: control target
= control target key end

     0   :  { %s3241_s15 = smov 0   ;;  %s4371_s0 = inlined_call_operand.vmem [shape: bf16[2048,160], index: 0, kind: input, shape index: {}]   ;;  %s4372_s1 = inlined_call_operand.vmem [shape: bf16[160,4], index: 1, kind: input, shape index: {}]   ;;  %s4373_s2 = inlined_call_operand.vmem [shape: f32[1,4], index: 2, kind: input, shape index: {}]   ;;  %s4374_s3 = inlined_call_operand.vmem [shape: f32[1,4], index: 3, kind: input, shape index: {}]   ;;  %s4375_s4 = inlined_call_operand.vmem [shape: f32[2048,4], index: 4, kind: output, shape index: {}]  }
   0x1 LB: > { %s2417_s16 = sadd.s32 4294967295, %s3214_s15   ;;  %p2421_p0 = scmp.ge.s32.totalorder %s3214_s15, 1  ;;  %s3214_s15 = sphi %s3241_s15, %s14_s15  }
   0x2   : > { %p164_p1 = scmp.lt.s32.totalorder %s3214_s15, 3 }
   0x4   : > { %p165_p2 = pnand %p2421_p0, %p164_p1 }
   0x5   : > { %s2422_s21 = sshll.u32 (!%p165_p2), %s2417_s16, 7 }
   0x6   : > { %168 = sbr.rel (%p165_p2) target bundleno = 689 (0x2b1), region = 36  ;;  %p192_p3 = scmp.lt.s32.totalorder (!%p165_p2), %s2422_s21, 255 }
   0xb   : > { %v3181_v0 = vld [vmem:[%s4372_s1 + $0x38] sm:$0xff]  ;;  %v3183_v1 = vld [vmem:[%s4372_s1 + $0x48] sm:$0xff]  ;;  %v3180_v2 = vld [vmem:[%s4372_s1 + $0x30] sm:$0xff]  ;;  %s4377_s21 = smov (!%p192_p3, %s2422_s21), 255  ;;  %vm989_vm0 = vcmask 261120   ;;  %vm2232_vm1 = vcmask 31744  }
   0xc   : > { %1182 = vmatpush.bf16.msra.mxu0 %v3181_v0  ;;  %3184 = vmatpush.bf16.msra.mxu2 %v3181_v0  ;;  %v3182_v3 = vld [vmem:[%s4372_s1 + $0x40] sm:$0xff]  ;;  %s3045_s26 = sshll.u32 %s4377_s21, 3  ;;  %v3179_v4 = vld [vmem:[%s4372_s1 + $0x28] sm:$0xff]  ;;  %v3177_v12 = vld [vmem:[%s4372_s1 + $0x18] sm:$0xff] }
   0xd   : > { %1517 = vmatpush.bf16.msra.mxu1 %v3183_v1  ;;  %3192 = vmatpush.bf16.msra.mxu3 %v3183_v1  ;;  %s3269_s29 = scalar_lea.vmem %s4371_s0, %s3045_s26  ;;  %v3178_v8 = vld [vmem:[%s4372_s1 + $0x20] sm:$0xff]  ;;  %v3176_v13 = vld [vmem:[%s4372_s1 + $0x10] sm:$0xff]  ;;  %v3175_v17 = vld [vmem:[%s4372_s1 + $0x8] sm:$0xff]  ;;  %s3410_s24 = scalar_lea.vmem %s4375_s4, %s3045_s26 }
   0xe   : > { %v3046_v5 = vld [vmem:[%s3269_s29 + $0x4] sm:$0xf]  ;;  %v2431_v6 = vld [vmem:[%s3269_s29 + $0x8] sm:$0xf0]  ;;  %v3112_v9 = vld [vmem:[%s3269_s29 + $0x214] sm:$0xf] }
   0xf   : > { %v2434_v7 = vor.u32 %v3046_v5, %v2431_v6  ;;  %v2695_v10 = vld [vmem:[%s3269_s29 + $0x218] sm:$0xf0]  ;;  %v3048_v14 = vld [vmem:[%s3269_s29 + $0x14] sm:$0xf]  ;;  %v3114_v18 = vld [vmem:[%s3269_s29 + $0x224] sm:$0xf] }
  0x10   : > { %1183 = vmatpush.bf16.msra.mxu0 %v3180_v2  ;;  %3185 = vmatpush.bf16.msra.mxu2 %v3180_v2  ;;  %v2698_v11 = vor.u32 %v3112_v9, %v2695_v10  ;;  %v2439_v15 = vld [vmem:[%s3269_s29 + $0x18] sm:$0xf0]  ;;  %v2703_v19 = vld [vmem:[%s3269_s29 + $0x228] sm:$0xf0]  ;;  %v3174_v21 = vld [vmem:[%s4372_s1] sm:$0xff] }
  0x11   : > { %1518 = vmatpush.bf16.msra.mxu1 %v3182_v3  ;;  %3193 = vmatpush.bf16.msra.mxu3 %v3182_v3  ;;  %v2442_v16 = vor.u32 %v3048_v14, %v2439_v15  ;;  %v2706_v20 = vor.u32 %v3114_v18, %v2703_v19  ;;  %v2429_v22 = vld [vmem:[%s3269_s29] sm:$0xf]  ;;  %v3047_v23 = vld [vmem:[%s3269_s29 + $0x4] sm:$0xf0]  ;;  %v3050_v28 = vld [vmem:[%s3269_s29 + $0x24] sm:$0xf] }
  0x12   : > { %v2685_v24 = vld [vmem:[%s3269_s29 + $0x200] sm:$0xf]  ;;  %v3111_v25 = vld [vmem:[%s3269_s29 + $0x204] sm:$0xf0]  ;;  %v2430_v26 = vor.u32 %v3047_v23, %v2429_v22  ;;  %v2447_v29 = vld [vmem:[%s3269_s29 + $0x28] sm:$0xf0] }
  0x13   : > { %v2686_v27 = vor.u32 %v3111_v25, %v2685_v24  ;;  %v2450_v30 = vor.u32 %v3050_v28, %v2447_v29  ;;  %v3116_v31 = vld [vmem:[%s3269_s29 + $0x234] sm:$0xf]  ;;  %v2711_v32 = vld [vmem:[%s3269_s29 + $0x238] sm:$0xf0]  ;;  %v2437_v34 = vld [vmem:[%s3269_s29 + $0x10] sm:$0xf] }
  0x14   : > { %2979 = vmatmul.msk.bf16.vlgmr.msra.gmra.mxu1 %vm989_vm0, %v2434_v7  ;;  %1184 = vmatpush.bf16.msra.mxu0 %v3179_v4  ;;  %v2714_v33 = vor.u32 %v3116_v31, %v2711_v32  ;;  %v3049_v35 = vld [vmem:[%s3269_s29 + $0x14] sm:$0xf0]  ;;  %v2693_v36 = vld [vmem:[%s3269_s29 + $0x210] sm:$0xf]  ;;  %v3052_v40 = vld [vmem:[%s3269_s29 + $0x34] sm:$0xf] }
  0x15   : > { %3186 = vmatpush.bf16.msra.mxu2 %v3179_v4  ;;  %3012 = vmatmul.msk.bf16.vlgmr.msra.gmra.mxu3 %vm989_vm0, %v2698_v11  ;;  %v3113_v37 = vld [vmem:[%s3269_s29 + $0x214] sm:$0xf0]  ;;  %v2438_v38 = vor.u32 %v3049_v35, %v2437_v34  ;;  %v2455_v41 = vld [vmem:[%s3269_s29 + $0x38] sm:$0xf0]  ;;  %v3118_v43 = vld [vmem:[%s3269_s29 + $0x244] sm:$0xf] }
  0x16   : > { %v2694_v39 = vor.u32 %v3113_v37, %v2693_v36  ;;  %v2458_v42 = vor.u32 %v3052_v40, %v2455_v41  ;;  %v2719_v44 = vld [vmem:[%s3269_s29 + $0x248] sm:$0xf0]  ;;  %v2445_v46 = vld [vmem:[%s3269_s29 + $0x20] sm:$0xf]  ;;  %v3051_v47 = vld [vmem:[%s3269_s29 + $0x24] sm:$0xf0] }
  0x17   : > { %v2722_v45 = vor.u32 %v3118_v43, %v2719_v44  ;;  %v2701_v48 = vld [vmem:[%s3269_s29 + $0x220] sm:$0xf]  ;;  %v3115_v49 = vld [vmem:[%s3269_s29 + $0x224] sm:$0xf0]  ;;  %v2446_v50 = vor.u32 %v3051_v47, %v2445_v46  ;;  %v3054_v52 = vld [vmem:[%s3269_s29 + $0x44] sm:$0xf] }
  0x18   : > { %1185 = vmatpush.bf16.msra.mxu0 %v3178_v8  ;;  %v2702_v51 = vor.u32 %v3115_v49, %v2701_v48  ;;  %v2463_v53 = vld [vmem:[%s3269_s29 + $0x48] sm:$0xf0]  ;;  %v3120_v55 = vld [vmem:[%s3269_s29 + $0x254] sm:$0xf]  ;;  %v2727_v56 = vld [vmem:[%s3269_s29 + $0x258] sm:$0xf0] }
  0x19   : > { %3187 = vmatpush.bf16.msra.mxu2 %v3178_v8  ;;  %v2466_v54 = vor.u32 %v3054_v52, %v2463_v53  ;;  %v2730_v57 = vor.u32 %v3120_v55, %v2727_v56  ;;  %v2453_v58 = vld [vmem:[%s3269_s29 + $0x30] sm:$0xf]  ;;  %v3053_v59 = vld [vmem:[%s3269_s29 + $0x34] sm:$0xf0]  ;;  %v3056_v0 = vld [vmem:[%s3269_s29 + $0x54] sm:$0xf] }
  0x1a   : > { %v2709_v60 = vld [vmem:[%s3269_s29 + $0x230] sm:$0xf]  ;;  %v3117_v61 = vld [vmem:[%s3269_s29 + $0x234] sm:$0xf0]  ;;  %v2454_v62 = vor.u32 %v3053_v59, %v2453_v58  ;;  %v2471_v1 = vld [vmem:[%s3269_s29 + $0x58] sm:$0xf0] }
  0x1b   : > { %v2710_v63 = vor.u32 %v3117_v61, %v2709_v60  ;;  %v2474_v2 = vor.u32 %v3056_v0, %v2471_v1  ;;  %v3122_v3 = vld [vmem:[%s3269_s29 + $0x264] sm:$0xf]  ;;  %v2735_v4 = vld [vmem:[%s3269_s29 + $0x268] sm:$0xf0]  ;;  %v2461_v6 = vld [vmem:[%s3269_s29 + $0x40] sm:$0xf] }
  0x1c   : > { %1186 = vmatpush.bf16.msra.mxu0 %v3177_v12  ;;  %v2738_v5 = vor.u32 %v3122_v3, %v2735_v4  ;;  %v3055_v7 = vld [vmem:[%s3269_s29 + $0x44] sm:$0xf0]  ;;  %v2717_v8 = vld [vmem:[%s3269_s29 + $0x240] sm:$0xf]  ;;  %v3124_v15 = vld [vmem:[%s3269_s29 + $0x274] sm:$0xf] }
  0x1d   : > { %3188 = vmatpush.bf16.msra.mxu2 %v3177_v12  ;;  %v3119_v9 = vld [vmem:[%s3269_s29 + $0x244] sm:$0xf0]  ;;  %v2462_v10 = vor.u32 %v3055_v7, %v2461_v6  ;;  %v3058_v12 = vld [vmem:[%s3269_s29 + $0x64] sm:$0xf]  ;;  %v2469_v18 = vld [vmem:[%s3269_s29 + $0x50] sm:$0xf] }
  0x1e   : > { %v2718_v11 = vor.u32 %v3119_v9, %v2717_v8  ;;  %v3057_v19 = vld [vmem:[%s3269_s29 + $0x54] sm:$0xf0]  ;;  %v3060_v24 = vld [vmem:[%s3269_s29 + $0x74] sm:$0xf]  ;;  %v2487_v25 = vld [vmem:[%s3269_s29 + $0x78] sm:$0xf0] }
  0x1f   : > { %v2470_v22 = vor.u32 %v3057_v19, %v2469_v18  ;;  %v2751_v28 = vld [vmem:[%s3269_s29 + $0x288] sm:$0xf0]  ;;  %v3059_v31 = vld [vmem:[%s3269_s29 + $0x64] sm:$0xf0]  ;;  %v2733_v32 = vld [vmem:[%s3269_s29 + $0x260] sm:$0xf] }
  0x20   : > { %1187 = vmatpush.bf16.msra.mxu0 %v3176_v13  ;;  %v3062_v36 = vld [vmem:[%s3269_s29 + $0x84] sm:$0xf]  ;;  %v2495_v37 = vld [vmem:[%s3269_s29 + $0x88] sm:$0xf0]  ;;  %v3128_v40 = vld [vmem:[%s3269_s29 + $0x294] sm:$0xf] }
  0x21   : > { %3189 = vmatpush.bf16.msra.mxu2 %v3176_v13  ;;  %v2479_v13 = vld [vmem:[%s3269_s29 + $0x68] sm:$0xf0]  ;;  %v2759_v41 = vld [vmem:[%s3269_s29 + $0x298] sm:$0xf0]  ;;  %v2485_v43 = vld [vmem:[%s3269_s29 + $0x70] sm:$0xf] }
  0x22   : > { %v2482_v14 = vor.u32 %v3058_v12, %v2479_v13  ;;  %v3061_v44 = vld [vmem:[%s3269_s29 + $0x74] sm:$0xf0]  ;;  %v2503_v52 = vld [vmem:[%s3269_s29 + $0x98] sm:$0xf0]  ;;  %v3130_v55 = vld [vmem:[%s3269_s29 + $0x2a4] sm:$0xf] }
  0x23   : > { %v3125_v46 = vld [vmem:[%s3269_s29 + $0x274] sm:$0xf0]  ;;  %v2486_v47 = vor.u32 %v3061_v44, %v2485_v43  ;;  %v2767_v56 = vld [vmem:[%s3269_s29 + $0x2a8] sm:$0xf0]  ;;  %v2493_v59 = vld [vmem:[%s3269_s29 + $0x80] sm:$0xf] }
  0x24   : > { %2980 = vmatmul.msk.bf16.gmra.mxu1 %vm989_vm0, %v2442_v16  ;;  %1188 = vmatpush.bf16.msra.mxu0 %v3175_v17  ;;  %v2743_v16 = vld [vmem:[%s3269_s29 + $0x278] sm:$0xf0]  ;;  %v2770_v58 = vor.u32 %v3130_v55, %v2767_v56  ;;  %v3063_v60 = vld [vmem:[%s3269_s29 + $0x84] sm:$0xf0]  ;;  %v2749_v61 = vld [vmem:[%s3269_s29 + $0x280] sm:$0xf] }
  0x25   : > { %3190 = vmatpush.bf16.msra.mxu2 %v3175_v17  ;;  %3013 = vmatmul.msk.bf16.gmra.mxu3 %vm989_vm0, %v2706_v20  ;;  %v2746_v17 = vor.u32 %v3124_v15, %v2743_v16  ;;  %v2725_v20 = vld [vmem:[%s3269_s29 + $0x250] sm:$0xf]  ;;  %v2494_v0 = vor.u32 %v3063_v60, %v2493_v59  ;;  %v3397_v4 = vld [vmem:[%s4374_s3] ss:$0 sm:$0xff]  ;;  %v3066_v9 = vld [vmem:[%s3269_s29 + $0xa4] sm:$0xf] }
  0x26   : > { %v2775_v18 = vld [vmem:[%s3269_s29 + $0x2b8] sm:$0xf0]  ;;  %v2765_v56 = vld [vmem:[%s3269_s29 + $0x2a0] sm:$0xf] }
  0x28   : > { %1189 = vmatpush.bf16.msra.mxu0 %v3174_v21 }
  0x29   : > { %3191 = vmatpush.bf16.msra.mxu2 %v3174_v21  ;;  %v3121_v21 = vld [vmem:[%s3269_s29 + $0x254] sm:$0xf0] }
  0x2a   : > { %v2726_v23 = vor.u32 %v3121_v21, %v2725_v20 }
  0x2b   : > { %1190 = vmatmul.bf16.vlgmr.msra.gmra.mxu0 %v2430_v26  ;;  %v2490_v26 = vor.u32 %v3060_v24, %v2487_v25  ;;  %v2757_v25 = vld [vmem:[%s3269_s29 + $0x290] sm:$0xf] }
  0x2c   : > { %1350 = vmatmul.bf16.vlgmr.msra.gmra.mxu2 %v2686_v27  ;;  %v3126_v27 = vld [vmem:[%s3269_s29 + $0x284] sm:$0xf] }
  0x2d   : > { %v2754_v29 = vor.u32 %v3126_v27, %v2751_v28 }
  0x34   : > { %2981 = vmatmul.msk.bf16.gmra.mxu1 %vm989_vm0, %v2450_v30  ;;  %v2477_v30 = vld [vmem:[%s3269_s29 + $0x60] sm:$0xf] }
  0x35   : > { %3014 = vmatmul.msk.bf16.gmra.mxu3 %vm989_vm0, %v2714_v33  ;;  %v3123_v33 = vld [vmem:[%s3269_s29 + $0x264] sm:$0xf0]  ;;  %v2478_v34 = vor.u32 %v3059_v31, %v2477_v30 }
  0x36   : > { %v2734_v35 = vor.u32 %v3123_v33, %v2733_v32 }
  0x3b   : > { %1195 = vmatmul.bf16.gmra.mxu0 %v2438_v38  ;;  %v2498_v38 = vor.u32 %v3062_v36, %v2495_v37  ;;  %v3068_v37 = vld [vmem:[%s3269_s29 + $0xb4] sm:$0xf] }
  0x3c   : > { %1355 = vmatmul.bf16.gmra.mxu2 %v2694_v39 }
  0x44   : > { %2982 = vmatmul.msk.bf16.gmra.mxu1 %vm989_vm0, %v2458_v42  ;;  %v2762_v42 = vor.u32 %v3128_v40, %v2759_v41 }
  0x45   : > { %3015 = vmatmul.msk.bf16.gmra.mxu3 %vm989_vm0, %v2722_v45  ;;  %v2741_v45 = vld [vmem:[%s3269_s29 + $0x270] sm:$0xf] }
  0x46   : > { %v2742_v48 = vor.u32 %v3125_v46, %v2741_v45  ;;  %v3134_v46 = vld [vmem:[%s3269_s29 + $0x2c4] sm:$0xf] }
  0x4b   : > { %1200 = vmatmul.bf16.gmra.mxu0 %v2446_v50 }
  0x4c   : > { %1360 = vmatmul.bf16.gmra.mxu2 %v2702_v51  ;;  %v3064_v51 = vld [vmem:[%s3269_s29 + $0x94] sm:$0xf] }
  0x4d   : > { %v2506_v53 = vor.u32 %v3064_v51, %v2503_v52 }
  0x54   : > { %2983 = vmatmul.msk.bf16.gmra.mxu1 %vm989_vm0, %v2466_v54 }
  0x55   : > { %3016 = vmatmul.msk.bf16.gmra.mxu3 %vm989_vm0, %v2730_v57 }
  0x5b   : > { %1205 = vmatmul.bf16.gmra.mxu0 %v2454_v62  ;;  %v3127_v62 = vld [vmem:[%s3269_s29 + $0x284] sm:$0xf0] }
  0x5c   : > { %1365 = vmatmul.bf16.gmra.mxu2 %v2710_v63  ;;  %v3391_v63 = vld [vmem:[%s4373_s2] ss:$0 sm:$0xff] }
  0x64   : > { %2984 = vmatmul.msk.bf16.gmra.mxu1 %vm989_vm0, %v2474_v2  ;;  %v2750_v2 = vor.u32 %v3127_v62, %v2749_v61 }
  0x65   : > { %3017 = vmatmul.msk.bf16.gmra.mxu3 %vm989_vm0, %v2738_v5 }
  0x6b   : > { %1210 = vmatmul.bf16.gmra.mxu0 %v2462_v10  ;;  %v2511_v10 = vld [vmem:[%s3269_s29 + $0xa8] sm:$0xf0] }
  0x6c   : > { %1370 = vmatmul.bf16.gmra.mxu2 %v2718_v11 }
  0x74   : > { %2985 = vmatmul.msk.bf16.gmra.mxu1 %vm989_vm0, %v2482_v14  ;;  %v2514_v14 = vor.u32 %v3066_v9, %v2511_v10 }
  0x75   : > { %3018 = vmatmul.msk.bf16.gmra.mxu3 %vm989_vm0, %v2746_v17  ;;  %v3132_v17 = vld [vmem:[%s3269_s29 + $0x2b4] sm:$0xf] }
  0x76   : > { %v2778_v21 = vor.u32 %v3132_v17, %v2775_v18 }
  0x7b   : > { %1215 = vmatmul.bf16.gmra.mxu0 %v2470_v22  ;;  %v2501_v22 = vld [vmem:[%s3269_s29 + $0x90] sm:$0xf] }
  0x7c   : > { %1375 = vmatmul.bf16.gmra.mxu2 %v2726_v23  ;;  %v3065_v23 = vld [vmem:[%s3269_s29 + $0x94] sm:$0xf0] }
  0x84   : > { %2986 = vmatmul.msk.bf16.gmra.mxu1 %vm989_vm0, %v2490_v26  ;;  %v3129_v26 = vld [vmem:[%s3269_s29 + $0x294] sm:$0xf0] }
  0x85   : > { %3019 = vmatmul.msk.bf16.gmra.mxu3 %vm989_vm0, %v2754_v29  ;;  %v2502_v29 = vor.u32 %v3065_v23, %v2501_v22  ;;  %v2758_v31 = vor.u32 %v3129_v26, %v2757_v25  ;;  %v3136_v23 = vld [vmem:[%s3269_s29 + $0x2d4] sm:$0xf] }
  0x8b   : > { %1220 = vmatmul.bf16.gmra.mxu0 %v2478_v34 }
  0x8c   : > { %1380 = vmatmul.bf16.gmra.mxu2 %v2734_v35 }
  0x91   : > { %v1520_v39 = vpop.f32.mrf.mxu1 }
  0x94   : > { %2987 = vmatmul.msk.bf16.gmra.mxu1 %vm989_vm0, %v2498_v38  ;;  %v2519_v38 = vld [vmem:[%s3269_s29 + $0xb8] sm:$0xf0] }
  0x95   : > { %3020 = vmatmul.msk.bf16.gmra.mxu3 %vm989_vm0, %v2762_v42  ;;  %v2522_v43 = vor.u32 %v3068_v37, %v2519_v38 }
  0x98   : > { %v3375_v50 = vpop.f32.mrf.mxu3 }
  0x99   : > { %v1522_v49 = vpop.f32.mrf.mxu1 }
  0x9b   : > { %1225 = vmatmul.bf16.gmra.mxu0 %v2486_v47  ;;  %v2783_v47 = vld [vmem:[%s3269_s29 + $0x2c8] sm:$0xf0] }
  0x9c   : > { %1385 = vmatmul.bf16.gmra.mxu2 %v2742_v48  ;;  %v2786_v52 = vor.u32 %v3134_v46, %v2783_v47 }
  0xa0   : > { %v3381_v57 = vpop.f32.mrf.mxu3 }
  0xa1   : > { %v1525_v54 = vpop.f32.mrf.mxu1 }
  0xa4   : > { %2988 = vmatmul.msk.bf16.gmra.mxu1 %vm989_vm0, %v2506_v53  ;;  %v2509_v53 = vld [vmem:[%s3269_s29 + $0xa0] sm:$0xf] }
  0xa5   : > { %3021 = vmatmul.msk.bf16.gmra.mxu3 %vm989_vm0, %v2770_v58  ;;  %v3131_v58 = vld [vmem:[%s3269_s29 + $0x2a4] sm:$0xf0] }
  0xa8   : > { %v1191_v1 = vpop.f32.mrf.mxu0  ;;  %v3399_v6 = vpop.f32.mrf.mxu3 }
  0xa9   : > { %v1521_v3 = vadd.f32 %v1520_v39, %v1191_v1  ;;  %v1527_v5 = vpop.f32.mrf.mxu1 }
  0xab   : > { %v1845_v7 = vmul.f32 %v3391_v63, %v1521_v3  ;;  %1230 = vmatmul.bf16.gmra.mxu0 %v2494_v0 }
  0xac   : > { %1390 = vmatmul.bf16.gmra.mxu2 %v2750_v2  ;;  %v2766_v2 = vor.u32 %v3131_v58, %v2765_v56 }
  0xad   : > { %v1976_v8 = vadd.f32 %v3397_v4, %v1845_v7 }
  0xaf   : > { %v2104_v11 = vmax.f32 %v1976_v8, 0.0  ;;  %v3412_v12 = vpop.f32.mrf.mxu2 }
  0xb0   : > { %v1193_v13 = vpop.f32.mrf.mxu0  ;;  %v3418_v19 = vpop.f32.mrf.mxu3 }
  0xb1   : > { %2233 = vst.msk [vmem:[%s3410_s24] sm:$0xff] %vm2232_vm1, %v2104_v11  ;;  %v1523_v15 = vadd.f32 %v1522_v49, %v1193_v13  ;;  %v1530_v16 = vpop.f32.mrf.mxu1  ;;  %v3070_v11 = vld [vmem:[%s3269_s29 + $0xc4] sm:$0xf]  ;;  %v2527_v13 = vld [vmem:[%s3269_s29 + $0xc8] sm:$0xf0] }
  0xb3   : > { %v1846_v20 = vmul.f32 %v3391_v63, %v1523_v15 }
  0xb4   : > { %2989 = vmatmul.msk.bf16.gmra.mxu1 %vm989_vm0, %v2514_v14 }
  0xb5   : > { %v1977_v24 = vadd.f32 %v3397_v4, %v1846_v20  ;;  %3022 = vmatmul.msk.bf16.gmra.mxu3 %vm989_vm0, %v2778_v21  ;;  %v2530_v20 = vor.u32 %v3070_v11, %v2527_v13 }
  0xb7   : > { %v2105_v27 = vmax.f32 %v1977_v24, 0.0  ;;  %v3427_v28 = vpop.f32.mrf.mxu2  ;;  %v2791_v24 = vld [vmem:[%s3269_s29 + $0x2d8] sm:$0xf0] }
  0xb8   : > { %v1196_v30 = vpop.f32.mrf.mxu0  ;;  %v3432_v34 = vpop.f32.mrf.mxu3 }
  0xb9   : > { %2234 = vst.msk [vmem:[%s3410_s24 + $0x8] sm:$0xff] %vm2232_vm1, %v2105_v27  ;;  %v1526_v32 = vadd.f32 %v1525_v54, %v1196_v30  ;;  %v1532_v33 = vpop.f32.mrf.mxu1  ;;  %v3067_v54 = vld [vmem:[%s3269_s29 + $0xa4] sm:$0xf0]  ;;  %v2517_v30 = vld [vmem:[%s3269_s29 + $0xb0] sm:$0xf] }
  0xba   : > { %v2510_v62 = vor.u32 %v3067_v54, %v2509_v53 }
  0xbb   : > { %v1847_v35 = vmul.f32 %v3391_v63, %v1526_v32  ;;  %1235 = vmatmul.bf16.gmra.mxu0 %v2502_v29  ;;  %v2794_v29 = vor.u32 %v3136_v23, %v2791_v24 }
  0xbc   : > { %1395 = vmatmul.bf16.gmra.mxu2 %v2758_v31  ;;  %v3069_v31 = vld [vmem:[%s3269_s29 + $0xb4] sm:$0xf0] }
  0xbd   : > { %v1978_v36 = vadd.f32 %v3397_v4, %v1847_v35  ;;  %v3133_v35 = vld [vmem:[%s3269_s29 + $0x2b4] sm:$0xf0] }
  0xbf   : > { %v2106_v39 = vmax.f32 %v1978_v36, 0.0  ;;  %v1356_v40 = vpop.f32.mrf.mxu2 }
  0xc0   : > { %v1686_v41 = vadd.f32 %v3375_v50, %v1356_v40  ;;  %v1198_v42 = vpop.f32.mrf.mxu0  ;;  %v3446_v49 = vpop.f32.mrf.mxu3 }
  0xc1   : > { %2235 = vst.msk [vmem:[%s3410_s24 + $0x10] sm:$0xff] %vm2232_vm1, %v2106_v39  ;;  %v1528_v44 = vadd.f32 %v1527_v5, %v1198_v42  ;;  %v3441_v45 = vpop.f32.mrf.mxu1  ;;  %v2518_v39 = vor.u32 %v3069_v31, %v2517_v30 }
  0xc2   : > { %v1911_v48 = vmul.f32 %v3391_v63, %v1686_v41 }
  0xc3   : > { %v1848_v51 = vmul.f32 %v3391_v63, %v1528_v44 }
  0xc4   : > { %v2042_v50 = vadd.f32 %v3397_v4, %v1911_v48  ;;  %2990 = vmatmul.msk.bf16.gmra.mxu1 %vm989_vm0, %v2522_v43 }
  0xc5   : > { %v1979_v55 = vadd.f32 %v3397_v4, %v1848_v51  ;;  %3023 = vmatmul.msk.bf16.gmra.mxu3 %vm989_vm0, %v2786_v52  ;;  %v3072_v52 = vld [vmem:[%s3269_s29 + $0xd4] sm:$0xf] }
  0xc6   : > { %v2170_v59 = vmax.f32 %v2042_v50, 0.0  ;;  %v2535_v50 = vld [vmem:[%s3269_s29 + $0xd8] sm:$0xf0] }
  0xc7   : > { %v2107_v60 = vmax.f32 %v1979_v55, 0.0  ;;  %v1358_v61 = vpop.f32.mrf.mxu2  ;;  %v2538_v58 = vor.u32 %v3072_v52, %v2535_v50 }
  0xc8   : > { %2299 = vst.msk [vmem:[%s3410_s24 + $0x210] sm:$0xff] %vm2232_vm1, %v2170_v59  ;;  %v1688_v0 = vadd.f32 %v3381_v57, %v1358_v61  ;;  %v1201_v1 = vpop.f32.mrf.mxu0  ;;  %v3463_v8 = vpop.f32.mrf.mxu3  ;;  %v3138_v61 = vld [vmem:[%s3269_s29 + $0x2e4] sm:$0xf] }
  0xc9   : > { %2236 = vst.msk [vmem:[%s3410_s24 + $0x18] sm:$0xff] %vm2232_vm1, %v2107_v60  ;;  %v1531_v3 = vadd.f32 %v1530_v16, %v1201_v1  ;;  %v1537_v5 = vpop.f32.mrf.mxu1 }
  0xca   : > { %v1912_v7 = vmul.f32 %v3391_v63, %v1688_v0 }
  0xcb   : > { %v1849_v9 = vmul.f32 %v3391_v63, %v1531_v3  ;;  %1240 = vmatmul.bf16.gmra.mxu0 %v2510_v62  ;;  %v2799_v62 = vld [vmem:[%s3269_s29 + $0x2e8] sm:$0xf0] }
  0xcc   : > { %v2043_v10 = vadd.f32 %v3397_v4, %v1912_v7  ;;  %1400 = vmatmul.bf16.gmra.mxu2 %v2766_v2  ;;  %v2802_v3 = vor.u32 %v3138_v61, %v2799_v62  ;;  %v2525_v7 = vld [vmem:[%s3269_s29 + $0xc0] sm:$0xf] }
  0xcd   : > { %v1980_v57 = vadd.f32 %v3397_v4, %v1849_v9  ;;  %v3071_v9 = vld [vmem:[%s3269_s29 + $0xc4] sm:$0xf0] }
  0xce   : > { %v2171_v14 = vmax.f32 %v2043_v10, 0.0  ;;  %v2781_v10 = vld [vmem:[%s3269_s29 + $0x2c0] sm:$0xf] }
  0xcf   : > { %v2108_v15 = vmax.f32 %v1980_v57, 0.0  ;;  %v1361_v16 = vpop.f32.mrf.mxu2  ;;  %v3135_v57 = vld [vmem:[%s3269_s29 + $0x2c4] sm:$0xf0] }
  0xd0   : > { %2300 = vst.msk [vmem:[%s3410_s24 + $0x218] sm:$0xff] %vm2232_vm1, %v2171_v14  ;;  %v1691_v17 = vadd.f32 %v3399_v6, %v1361_v16  ;;  %v1203_v18 = vpop.f32.mrf.mxu0  ;;  %v3480_v26 = vpop.f32.mrf.mxu3 }
  0xd1   : > { %2237 = vst.msk [vmem:[%s3410_s24 + $0x20] sm:$0xff] %vm2232_vm1, %v2108_v15  ;;  %v1533_v21 = vadd.f32 %v1532_v33, %v1203_v18  ;;  %v3475_v22 = vpop.f32.mrf.mxu1  ;;  %v2773_v33 = vld [vmem:[%s3269_s29 + $0x2b0] sm:$0xf]  ;;  %v2526_v15 = vor.u32 %v3071_v9, %v2525_v7  ;;  %v2782_v18 = vor.u32 %v3135_v57, %v2781_v10 }
  0xd2   : > { %v1913_v25 = vmul.f32 %v3391_v63, %v1691_v17  ;;  %v2774_v42 = vor.u32 %v3133_v35, %v2773_v33 }
  0xd3   : > { %v1850_v27 = vmul.f32 %v3391_v63, %v1533_v21 }
  0xd4   : > { %v2044_v6 = vadd.f32 %v3397_v4, %v1913_v25  ;;  %2991 = vmatmul.msk.bf16.gmra.mxu1 %vm989_vm0, %v2530_v20 }
  0xd5   : > { %v1981_v32 = vadd.f32 %v3397_v4, %v1850_v27  ;;  %3024 = vmatmul.msk.bf16.gmra.mxu3 %vm989_vm0, %v2794_v29  ;;  %v3074_v29 = vld [vmem:[%s3269_s29 + $0xe4] sm:$0xf] }
  0xd6   : > { %v2172_v36 = vmax.f32 %v2044_v6, 0.0  ;;  %v2543_v6 = vld [vmem:[%s3269_s29 + $0xe8] sm:$0xf0] }
  0xd7   : > { %v2109_v37 = vmax.f32 %v1981_v32, 0.0  ;;  %v1363_v38 = vpop.f32.mrf.mxu2  ;;  %v2546_v35 = vor.u32 %v3074_v29, %v2543_v6 }
  0xd8   : > { %2301 = vst.msk [vmem:[%s3410_s24 + $0x220] sm:$0xff] %vm2232_vm1, %v2172_v36  ;;  %v1693_v40 = vadd.f32 %v3418_v19, %v1363_v38  ;;  %v1206_v41 = vpop.f32.mrf.mxu0  ;;  %v3498_v47 = vpop.f32.mrf.mxu3  ;;  %v3140_v38 = vld [vmem:[%s3269_s29 + $0x2f4] sm:$0xf] }
  0xd9   : > { %2238 = vst.msk [vmem:[%s3410_s24 + $0x28] sm:$0xff] %vm2232_vm1, %v2109_v37  ;;  %v1536_v43 = vadd.f32 %v3441_v45, %v1206_v41  ;;  %v1542_v44 = vpop.f32.mrf.mxu1 }
  0xda   : > { %v1914_v46 = vmul.f32 %v3391_v63, %v1693_v40 }
  0xdb   : > { %v1851_v48 = vmul.f32 %v3391_v63, %v1536_v43  ;;  %1245 = vmatmul.bf16.gmra.mxu0 %v2518_v39  ;;  %v2807_v39 = vld [vmem:[%s3269_s29 + $0x2f8] sm:$0xf0] }
  0xdc   : > { %v2045_v51 = vadd.f32 %v3397_v4, %v1914_v46  ;;  %1405 = vmatmul.bf16.gmra.mxu2 %v2774_v42  ;;  %v2810_v43 = vor.u32 %v3140_v38, %v2807_v39  ;;  %v2533_v46 = vld [vmem:[%s3269_s29 + $0xd0] sm:$0xf] }
  0xdd   : > { %v1982_v19 = vadd.f32 %v3397_v4, %v1851_v48  ;;  %v3073_v48 = vld [vmem:[%s3269_s29 + $0xd4] sm:$0xf0] }
  0xde   : > { %v2173_v53 = vmax.f32 %v2045_v51, 0.0  ;;  %v2789_v51 = vld [vmem:[%s3269_s29 + $0x2d0] sm:$0xf] }
  0xdf   : > { %v2110_v45 = vmax.f32 %v1982_v19, 0.0  ;;  %v1366_v54 = vpop.f32.mrf.mxu2  ;;  %v3137_v19 = vld [vmem:[%s3269_s29 + $0x2d4] sm:$0xf0] }
  0xe0   : > { %2302 = vst.msk [vmem:[%s3410_s24 + $0x228] sm:$0xff] %vm2232_vm1, %v2173_v53  ;;  %v1696_v55 = vadd.f32 %v3432_v34, %v1366_v54  ;;  %v1208_v56 = vpop.f32.mrf.mxu0  ;;  %v3515_v1 = vpop.f32.mrf.mxu3 }
  0xe1   : > { %2239 = vst.msk [vmem:[%s3410_s24 + $0x30] sm:$0xff] %vm2232_vm1, %v2110_v45  ;;  %v1538_v59 = vadd.f32 %v1537_v5, %v1208_v56  ;;  %v3510_v60 = vpop.f32.mrf.mxu1  ;;  %v2534_v45 = vor.u32 %v3073_v48, %v2533_v46  ;;  %v2790_v56 = vor.u32 %v3137_v19, %v2789_v51 }
  0xe2   : > { %v1915_v0 = vmul.f32 %v3391_v63, %v1696_v55 }
  0xe3   : > { %v1852_v2 = vmul.f32 %v3391_v63, %v1538_v59 }
  0xe4   : > { %v2046_v34 = vadd.f32 %v3397_v4, %v1915_v0  ;;  %2992 = vmatmul.msk.bf16.gmra.mxu1 %vm989_vm0, %v2538_v58 }
  0xe5   : > { %v1983_v5 = vadd.f32 %v3397_v4, %v1852_v2  ;;  %3025 = vmatmul.msk.bf16.gmra.mxu3 %vm989_vm0, %v2802_v3  ;;  %v3076_v3 = vld [vmem:[%s3269_s29 + $0xf4] sm:$0xf] }
  0xe6   : > { %v2174_v11 = vmax.f32 %v2046_v34, 0.0  ;;  %v2551_v34 = vld [vmem:[%s3269_s29 + $0xf8] sm:$0xf0] }
  0xe7   : > { %v2111_v13 = vmax.f32 %v1983_v5, 0.0  ;;  %v1368_v14 = vpop.f32.mrf.mxu2  ;;  %v2554_v57 = vor.u32 %v3076_v3, %v2551_v34 }
  0xe8   : > { %2303 = vst.msk [vmem:[%s3410_s24 + $0x230] sm:$0xff] %vm2232_vm1, %v2174_v11  ;;  %v1698_v16 = vadd.f32 %v3446_v49, %v1368_v14  ;;  %v1211_v17 = vpop.f32.mrf.mxu0  ;;  %v3533_v24 = vpop.f32.mrf.mxu3  ;;  %v3142_v14 = vld [vmem:[%s3269_s29 + $0x304] sm:$0xf] }
  0xe9   : > { %2240 = vst.msk [vmem:[%s3410_s24 + $0x38] sm:$0xff] %vm2232_vm1, %v2111_v13  ;;  %v1541_v20 = vadd.f32 %v3475_v22, %v1211_v17  ;;  %v1547_v21 = vpop.f32.mrf.mxu1 }
  0xea   : > { %v1916_v23 = vmul.f32 %v3391_v63, %v1698_v16 }
  0xeb   : > { %v1853_v25 = vmul.f32 %v3391_v63, %v1541_v20  ;;  %1250 = vmatmul.bf16.gmra.mxu0 %v2526_v15  ;;  %v2815_v15 = vld [vmem:[%s3269_s29 + $0x308] sm:$0xf0] }
  0xec   : > { %v2047_v27 = vadd.f32 %v3397_v4, %v1916_v23  ;;  %1410 = vmatmul.bf16.gmra.mxu2 %v2782_v18  ;;  %v2818_v20 = vor.u32 %v3142_v14, %v2815_v15  ;;  %v2541_v23 = vld [vmem:[%s3269_s29 + $0xe0] sm:$0xf] }
  0xed   : > { %v1984_v49 = vadd.f32 %v3397_v4, %v1853_v25  ;;  %v3075_v25 = vld [vmem:[%s3269_s29 + $0xe4] sm:$0xf0] }
  0xee   : > { %v2175_v30 = vmax.f32 %v2047_v27, 0.0  ;;  %v2797_v27 = vld [vmem:[%s3269_s29 + $0x2e0] sm:$0xf] }
  0xef   : > { %v2112_v22 = vmax.f32 %v1984_v49, 0.0  ;;  %v1371_v31 = vpop.f32.mrf.mxu2  ;;  %v3139_v49 = vld [vmem:[%s3269_s29 + $0x2e4] sm:$0xf0] }
  0xf0   : > { %2304 = vst.msk [vmem:[%s3410_s24 + $0x238] sm:$0xff] %vm2232_vm1, %v2175_v30  ;;  %v1701_v32 = vadd.f32 %v3463_v8, %v1371_v31  ;;  %v1213_v33 = vpop.f32.mrf.mxu0  ;;  %v3550_v41 = vpop.f32.mrf.mxu3 }
  0xf1   : > { %2241 = vst.msk [vmem:[%s3410_s24 + $0x40] sm:$0xff] %vm2232_vm1, %v2112_v22  ;;  %v1543_v36 = vadd.f32 %v1542_v44, %v1213_v33  ;;  %v3545_v37 = vpop.f32.mrf.mxu1  ;;  %v2542_v22 = vor.u32 %v3075_v25, %v2541_v23  ;;  %v2798_v33 = vor.u32 %v3139_v49, %v2797_v27 }
  0xf2   : > { %v1917_v40 = vmul.f32 %v3391_v63, %v1701_v32 }
  0xf3   : > { %v1854_v42 = vmul.f32 %v3391_v63, %v1543_v36 }
  0xf4   : > { %v2048_v8 = vadd.f32 %v3397_v4, %v1917_v40  ;;  %2993 = vmatmul.msk.bf16.gmra.mxu1 %vm989_vm0, %v2546_v35 }
  0xf5   : > { %v1985_v44 = vadd.f32 %v3397_v4, %v1854_v42  ;;  %3026 = vmatmul.msk.bf16.gmra.mxu3 %vm989_vm0, %v2810_v43  ;;  %v3078_v43 = vld [vmem:[%s3269_s29 + $0x104] sm:$0xf] }
  0xf6   : > { %v2176_v52 = vmax.f32 %v2048_v8, 0.0  ;;  %v2559_v8 = vld [vmem:[%s3269_s29 + $0x108] sm:$0xf0] }
  0xf7   : > { %v2113_v50 = vmax.f32 %v1985_v44, 0.0  ;;  %v1373_v53 = vpop.f32.mrf.mxu2  ;;  %v2562_v19 = vor.u32 %v3078_v43, %v2559_v8 }
  0xf8   : > { %2305 = vst.msk [vmem:[%s3410_s24 + $0x240] sm:$0xff] %vm2232_vm1, %v2176_v52  ;;  %v1703_v54 = vadd.f32 %v3480_v26, %v1373_v53  ;;  %v1216_v55 = vpop.f32.mrf.mxu0  ;;  %v3568_v62 = vpop.f32.mrf.mxu3  ;;  %v3144_v53 = vld [vmem:[%s3269_s29 + $0x314] sm:$0xf] }
  0xf9   : > { %2242 = vst.msk [vmem:[%s3410_s24 + $0x48] sm:$0xff] %vm2232_vm1, %v2113_v50  ;;  %v1546_v58 = vadd.f32 %v3510_v60, %v1216_v55  ;;  %v1552_v59 = vpop.f32.mrf.mxu1 }
  0xfa   : > { %v1918_v61 = vmul.f32 %v3391_v63, %v1703_v54 }
  0xfb   : > { %v1855_v0 = vmul.f32 %v3391_v63, %v1546_v58  ;;  %1255 = vmatmul.bf16.gmra.mxu0 %v2534_v45  ;;  %v2823_v45 = vld [vmem:[%s3269_s29 + $0x318] sm:$0xf0] }
  0xfc   : > { %v2049_v2 = vadd.f32 %v3397_v4, %v1918_v61  ;;  %1415 = vmatmul.bf16.gmra.mxu2 %v2790_v56  ;;  %v2826_v58 = vor.u32 %v3144_v53, %v2823_v45  ;;  %v2549_v61 = vld [vmem:[%s3269_s29 + $0xf0] sm:$0xf] }
  0xfd   : > { %v1986_v26 = vadd.f32 %v3397_v4, %v1855_v0  ;;  %v3077_v0 = vld [vmem:[%s3269_s29 + $0xf4] sm:$0xf0] }
  0xfe   : > { %v2177_v7 = vmax.f32 %v2049_v2, 0.0  ;;  %v2805_v2 = vld [vmem:[%s3269_s29 + $0x2f0] sm:$0xf] }
  0xff   : > { %v2114_v60 = vmax.f32 %v1986_v26, 0.0  ;;  %v1376_v9 = vpop.f32.mrf.mxu2  ;;  %v3141_v26 = vld [vmem:[%s3269_s29 + $0x2f4] sm:$0xf0] }
 0x100   : > { %2306 = vst.msk [vmem:[%s3410_s24 + $0x248] sm:$0xff] %vm2232_vm1, %v2177_v7  ;;  %v1706_v5 = vadd.f32 %v3498_v47, %v1376_v9  ;;  %v1218_v10 = vpop.f32.mrf.mxu0  ;;  %v3585_v17 = vpop.f32.mrf.mxu3 }
 0x101   : > { %2243 = vst.msk [vmem:[%s3410_s24 + $0x50] sm:$0xff] %vm2232_vm1, %v2114_v60  ;;  %v1548_v11 = vadd.f32 %v1547_v21, %v1218_v10  ;;  %v3580_v13 = vpop.f32.mrf.mxu1  ;;  %v2550_v60 = vor.u32 %v3077_v0, %v2549_v61  ;;  %v2806_v10 = vor.u32 %v3141_v26, %v2805_v2 }
 0x102   : > { %v1919_v16 = vmul.f32 %v3391_v63, %v1706_v5 }
 0x103   : > { %v1856_v18 = vmul.f32 %v3391_v63, %v1548_v11 }
 0x104   : > { %v2050_v47 = vadd.f32 %v3397_v4, %v1919_v16  ;;  %2994 = vmatmul.msk.bf16.gmra.mxu1 %vm989_vm0, %v2554_v57 }
 0x105   : > { %v1987_v21 = vadd.f32 %v3397_v4, %v1856_v18  ;;  %3027 = vmatmul.msk.bf16.gmra.mxu3 %vm989_vm0, %v2818_v20  ;;  %v3080_v20 = vld [vmem:[%s3269_s29 + $0x114] sm:$0xf] }
 0x106   : > { %v2178_v29 = vmax.f32 %v2050_v47, 0.0  ;;  %v2567_v47 = vld [vmem:[%s3269_s29 + $0x118] sm:$0xf0] }
 0x107   : > { %v2115_v6 = vmax.f32 %v1987_v21, 0.0  ;;  %v1378_v30 = vpop.f32.mrf.mxu2  ;;  %v2570_v49 = vor.u32 %v3080_v20, %v2567_v47 }
 0x108   : > { %2307 = vst.msk [vmem:[%s3410_s24 + $0x250] sm:$0xff] %vm2232_vm1, %v2178_v29  ;;  %v1708_v31 = vadd.f32 %v3515_v1, %v1378_v30  ;;  %v1221_v32 = vpop.f32.mrf.mxu0  ;;  %v3603_v39 = vpop.f32.mrf.mxu3  ;;  %v3146_v30 = vld [vmem:[%s3269_s29 + $0x324] sm:$0xf] }
 0x109   : > { %2244 = vst.msk [vmem:[%s3410_s24 + $0x58] sm:$0xff] %vm2232_vm1, %v2115_v6  ;;  %v1551_v35 = vadd.f32 %v3545_v37, %v1221_v32  ;;  %v1557_v36 = vpop.f32.mrf.mxu1 }
 0x10a   : > { %v1920_v38 = vmul.f32 %v3391_v63, %v1708_v31 }
 0x10b   : > { %v1857_v40 = vmul.f32 %v3391_v63, %v1551_v35  ;;  %1260 = vmatmul.bf16.gmra.mxu0 %v2542_v22  ;;  %v2831_v22 = vld [vmem:[%s3269_s29 + $0x328] sm:$0xf0] }
 0x10c   : > { %v2051_v42 = vadd.f32 %v3397_v4, %v1920_v38  ;;  %1420 = vmatmul.bf16.gmra.mxu2 %v2798_v33  ;;  %v2834_v35 = vor.u32 %v3146_v30, %v2831_v22  ;;  %v2557_v38 = vld [vmem:[%s3269_s29 + $0x100] sm:$0xf] }
 0x10d   : > { %v1988_v1 = vadd.f32 %v3397_v4, %v1857_v40  ;;  %v3079_v40 = vld [vmem:[%s3269_s29 + $0x104] sm:$0xf0] }
 0x10e   : > { %v2179_v46 = vmax.f32 %v2051_v42, 0.0  ;;  %v2813_v42 = vld [vmem:[%s3269_s29 + $0x300] sm:$0xf] }
 0x10f   : > { %v2116_v37 = vmax.f32 %v1988_v1, 0.0  ;;  %v1381_v48 = vpop.f32.mrf.mxu2  ;;  %v3143_v1 = vld [vmem:[%s3269_s29 + $0x304] sm:$0xf0] }
 0x110   : > { %2308 = vst.msk [vmem:[%s3410_s24 + $0x258] sm:$0xff] %vm2232_vm1, %v2179_v46  ;;  %v1711_v44 = vadd.f32 %v3533_v24, %v1381_v48  ;;  %v1223_v51 = vpop.f32.mrf.mxu0  ;;  %v3620_v55 = vpop.f32.mrf.mxu3 }
 0x111   : > { %2245 = vst.msk [vmem:[%s3410_s24 + $0x60] sm:$0xff] %vm2232_vm1, %v2116_v37  ;;  %v1553_v52 = vadd.f32 %v1552_v59, %v1223_v51  ;;  %v3615_v50 = vpop.f32.mrf.mxu1  ;;  %v2558_v37 = vor.u32 %v3079_v40, %v2557_v38  ;;  %v2814_v51 = vor.u32 %v3143_v1, %v2813_v42 }
 0x112   : > { %v1921_v54 = vmul.f32 %v3391_v63, %v1711_v44 }
 0x113   : > { %v1858_v56 = vmul.f32 %v3391_v63, %v1553_v52 }
 0x114   : > { %v2052_v24 = vadd.f32 %v3397_v4, %v1921_v54  ;;  %2995 = vmatmul.msk.bf16.gmra.mxu1 %vm989_vm0, %v2562_v19 }
 0x115   : > { %v1989_v59 = vadd.f32 %v3397_v4, %v1858_v56  ;;  %3028 = vmatmul.msk.bf16.gmra.mxu3 %vm989_vm0, %v2826_v58  ;;  %v3082_v58 = vld [vmem:[%s3269_s29 + $0x124] sm:$0xf] }
 0x116   : > { %v2180_v3 = vmax.f32 %v2052_v24, 0.0  ;;  %v2575_v24 = vld [vmem:[%s3269_s29 + $0x128] sm:$0xf0] }
 0x117   : > { %v2117_v34 = vmax.f32 %v1989_v59, 0.0  ;;  %v1383_v7 = vpop.f32.mrf.mxu2  ;;  %v2578_v26 = vor.u32 %v3082_v58, %v2575_v24 }
 0x118   : > { %2309 = vst.msk [vmem:[%s3410_s24 + $0x260] sm:$0xff] %vm2232_vm1, %v2180_v3  ;;  %v1713_v9 = vadd.f32 %v3550_v41, %v1383_v7  ;;  %v1226_v5 = vpop.f32.mrf.mxu0  ;;  %v3638_v15 = vpop.f32.mrf.mxu3  ;;  %v3148_v7 = vld [vmem:[%s3269_s29 + $0x334] sm:$0xf] }
 0x119   : > { %2246 = vst.msk [vmem:[%s3410_s24 + $0x68] sm:$0xff] %vm2232_vm1, %v2117_v34  ;;  %v1556_v57 = vadd.f32 %v3580_v13, %v1226_v5  ;;  %v1562_v11 = vpop.f32.mrf.mxu1 }
 0x11a   : > { %v1922_v14 = vmul.f32 %v3391_v63, %v1713_v9 }
 0x11b   : > { %v1859_v16 = vmul.f32 %v3391_v63, %v1556_v57  ;;  %1265 = vmatmul.bf16.gmra.mxu0 %v2550_v60  ;;  %v2839_v60 = vld [vmem:[%s3269_s29 + $0x338] sm:$0xf0] }
 0x11c   : > { %v2053_v18 = vadd.f32 %v3397_v4, %v1922_v14  ;;  %1425 = vmatmul.bf16.gmra.mxu2 %v2806_v10  ;;  %v2842_v57 = vor.u32 %v3148_v7, %v2839_v60  ;;  %v2565_v14 = vld [vmem:[%s3269_s29 + $0x110] sm:$0xf] }
 0x11d   : > { %v1990_v41 = vadd.f32 %v3397_v4, %v1859_v16  ;;  %v3081_v16 = vld [vmem:[%s3269_s29 + $0x114] sm:$0xf0] }
 0x11e   : > { %v2181_v23 = vmax.f32 %v2053_v18, 0.0  ;;  %v2821_v18 = vld [vmem:[%s3269_s29 + $0x310] sm:$0xf] }
 0x11f   : > { %v2118_v13 = vmax.f32 %v1990_v41, 0.0  ;;  %v1386_v25 = vpop.f32.mrf.mxu2  ;;  %v3145_v41 = vld [vmem:[%s3269_s29 + $0x314] sm:$0xf0] }
 0x120   : > { %2310 = vst.msk [vmem:[%s3410_s24 + $0x268] sm:$0xff] %vm2232_vm1, %v2181_v23  ;;  %v1716_v21 = vadd.f32 %v3568_v62, %v1386_v25  ;;  %v1228_v27 = vpop.f32.mrf.mxu0  ;;  %v3655_v32 = vpop.f32.mrf.mxu3 }
 0x121   : > { %2247 = vst.msk [vmem:[%s3410_s24 + $0x70] sm:$0xff] %vm2232_vm1, %v2118_v13  ;;  %v1558_v29 = vadd.f32 %v1557_v36, %v1228_v27  ;;  %v3650_v6 = vpop.f32.mrf.mxu1  ;;  %v2566_v13 = vor.u32 %v3081_v16, %v2565_v14  ;;  %v2822_v27 = vor.u32 %v3145_v41, %v2821_v18 }
 0x122   : > { %v1923_v31 = vmul.f32 %v3391_v63, %v1716_v21 }
 0x123   : > { %v1860_v33 = vmul.f32 %v3391_v63, %v1558_v29 }
 0x124   : > { %v2054_v62 = vadd.f32 %v3397_v4, %v1923_v31  ;;  %2996 = vmatmul.msk.bf16.gmra.mxu1 %vm989_vm0, %v2570_v49 }
 0x125   : > { %v1991_v36 = vadd.f32 %v3397_v4, %v1860_v33  ;;  %3029 = vmatmul.msk.bf16.gmra.mxu3 %vm989_vm0, %v2834_v35  ;;  %v3084_v35 = vld [vmem:[%s3269_s29 + $0x134] sm:$0xf] }
 0x126   : > { %v2182_v43 = vmax.f32 %v2054_v62, 0.0  ;;  %v2583_v62 = vld [vmem:[%s3269_s29 + $0x138] sm:$0xf0] }
 0x127   : > { %v2119_v8 = vmax.f32 %v1991_v36, 0.0  ;;  %v1388_v46 = vpop.f32.mrf.mxu2  ;;  %v2586_v1 = vor.u32 %v3084_v35, %v2583_v62 }
 0x128   : > { %2311 = vst.msk [vmem:[%s3410_s24 + $0x270] sm:$0xff] %vm2232_vm1, %v2182_v43  ;;  %v1718_v48 = vadd.f32 %v3585_v17, %v1388_v46  ;;  %v1231_v44 = vpop.f32.mrf.mxu0  ;;  %v3673_v45 = vpop.f32.mrf.mxu3  ;;  %v3150_v46 = vld [vmem:[%s3269_s29 + $0x344] sm:$0xf] }
 0x129   : > { %2248 = vst.msk [vmem:[%s3410_s24 + $0x78] sm:$0xff] %vm2232_vm1, %v2119_v8  ;;  %v1561_v19 = vadd.f32 %v3615_v50, %v1231_v44  ;;  %v1567_v52 = vpop.f32.mrf.mxu1 }
 0x12a   : > { %v1924_v53 = vmul.f32 %v3391_v63, %v1718_v48 }
 0x12b   : > { %v1861_v54 = vmul.f32 %v3391_v63, %v1561_v19  ;;  %1270 = vmatmul.bf16.gmra.mxu0 %v2558_v37  ;;  %v2847_v37 = vld [vmem:[%s3269_s29 + $0x348] sm:$0xf0] }
 0x12c   : > { %v2055_v56 = vadd.f32 %v3397_v4, %v1924_v53  ;;  %1430 = vmatmul.bf16.gmra.mxu2 %v2814_v51  ;;  %v2850_v19 = vor.u32 %v3150_v46, %v2847_v37  ;;  %v2573_v53 = vld [vmem:[%s3269_s29 + $0x120] sm:$0xf] }
 0x12d   : > { %v1992_v17 = vadd.f32 %v3397_v4, %v1861_v54  ;;  %v3083_v54 = vld [vmem:[%s3269_s29 + $0x124] sm:$0xf0] }
 0x12e   : > { %v2183_v61 = vmax.f32 %v2055_v56, 0.0  ;;  %v2829_v56 = vld [vmem:[%s3269_s29 + $0x320] sm:$0xf] }
 0x12f   : > { %v2120_v50 = vmax.f32 %v1992_v17, 0.0  ;;  %v1391_v0 = vpop.f32.mrf.mxu2  ;;  %v3147_v17 = vld [vmem:[%s3269_s29 + $0x324] sm:$0xf0] }
 0x130   : > { %2312 = vst.msk [vmem:[%s3410_s24 + $0x278] sm:$0xff] %vm2232_vm1, %v2183_v61  ;;  %v1721_v59 = vadd.f32 %v3603_v39, %v1391_v0  ;;  %v1233_v2 = vpop.f32.mrf.mxu0  ;;  %v3690_v5 = vpop.f32.mrf.mxu3 }
 0x131   : > { %2249 = vst.msk [vmem:[%s3410_s24 + $0x80] sm:$0xff] %vm2232_vm1, %v2120_v50  ;;  %v1563_v3 = vadd.f32 %v1562_v11, %v1233_v2  ;;  %v3685_v34 = vpop.f32.mrf.mxu1  ;;  %v2574_v50 = vor.u32 %v3083_v54, %v2573_v53  ;;  %v2830_v2 = vor.u32 %v3147_v17, %v2829_v56 }
 0x132   : > { %v1925_v9 = vmul.f32 %v3391_v63, %v1721_v59 }
 0x133   : > { %v1862_v10 = vmul.f32 %v3391_v63, %v1563_v3 }
 0x134   : > { %v2056_v39 = vadd.f32 %v3397_v4, %v1925_v9  ;;  %2997 = vmatmul.msk.bf16.gmra.mxu1 %vm989_vm0, %v2578_v26 }
 0x135   : > { %v1993_v11 = vadd.f32 %v3397_v4, %v1862_v10  ;;  %3030 = vmatmul.msk.bf16.gmra.mxu3 %vm989_vm0, %v2842_v57  ;;  %v3086_v57 = vld [vmem:[%s3269_s29 + $0x144] sm:$0xf] }
 0x136   : > { %v2184_v20 = vmax.f32 %v2056_v39, 0.0  ;;  %v2591_v39 = vld [vmem:[%s3269_s29 + $0x148] sm:$0xf0] }
 0x137   : > { %v2121_v47 = vmax.f32 %v1993_v11, 0.0  ;;  %v1393_v23 = vpop.f32.mrf.mxu2  ;;  %v2594_v41 = vor.u32 %v3086_v57, %v2591_v39 }
 0x138   : > { %2313 = vst.msk [vmem:[%s3410_s24 + $0x280] sm:$0xff] %vm2232_vm1, %v2184_v20  ;;  %v1723_v25 = vadd.f32 %v3620_v55, %v1393_v23  ;;  %v1236_v21 = vpop.f32.mrf.mxu0  ;;  %v3708_v22 = vpop.f32.mrf.mxu3  ;;  %v3152_v23 = vld [vmem:[%s3269_s29 + $0x354] sm:$0xf] }
 0x139   : > { %2250 = vst.msk [vmem:[%s3410_s24 + $0x88] sm:$0xff] %vm2232_vm1, %v2121_v47  ;;  %v1566_v49 = vadd.f32 %v3650_v6, %v1236_v21  ;;  %v1572_v29 = vpop.f32.mrf.mxu1 }
 0x13a   : > { %v1926_v30 = vmul.f32 %v3391_v63, %v1723_v25 }
 0x13b   : > { %v1863_v31 = vmul.f32 %v3391_v63, %v1566_v49  ;;  %1275 = vmatmul.bf16.gmra.mxu0 %v2566_v13  ;;  %v2855_v13 = vld [vmem:[%s3269_s29 + $0x358] sm:$0xf0] }
 0x13c   : > { %v2057_v33 = vadd.f32 %v3397_v4, %v1926_v30  ;;  %1435 = vmatmul.bf16.gmra.mxu2 %v2822_v27  ;;  %v2858_v49 = vor.u32 %v3152_v23, %v2855_v13  ;;  %v2581_v30 = vld [vmem:[%s3269_s29 + $0x130] sm:$0xf] }
 0x13d   : > { %v1994_v55 = vadd.f32 %v3397_v4, %v1863_v31  ;;  %v3085_v31 = vld [vmem:[%s3269_s29 + $0x134] sm:$0xf0] }
 0x13e   : > { %v2185_v38 = vmax.f32 %v2057_v33, 0.0  ;;  %v2837_v33 = vld [vmem:[%s3269_s29 + $0x330] sm:$0xf] }
 0x13f   : > { %v2122_v6 = vmax.f32 %v1994_v55, 0.0  ;;  %v1396_v40 = vpop.f32.mrf.mxu2  ;;  %v3149_v55 = vld [vmem:[%s3269_s29 + $0x334] sm:$0xf0] }
 0x140   : > { %2314 = vst.msk [vmem:[%s3410_s24 + $0x288] sm:$0xff] %vm2232_vm1, %v2185_v38  ;;  %v1726_v36 = vadd.f32 %v3638_v15, %v1396_v40  ;;  %v1238_v42 = vpop.f32.mrf.mxu0  ;;  %v3725_v44 = vpop.f32.mrf.mxu3 }
 0x141   : > { %2251 = vst.msk [vmem:[%s3410_s24 + $0x90] sm:$0xff] %vm2232_vm1, %v2122_v6  ;;  %v1568_v43 = vadd.f32 %v1567_v52, %v1238_v42  ;;  %v3720_v8 = vpop.f32.mrf.mxu1  ;;  %v2582_v6 = vor.u32 %v3085_v31, %v2581_v30  ;;  %v2838_v42 = vor.u32 %v3149_v55, %v2837_v33 }
 0x142   : > { %v1927_v48 = vmul.f32 %v3391_v63, %v1726_v36 }
 0x143   : > { %v1864_v51 = vmul.f32 %v3391_v63, %v1568_v43 }
 0x144   : > { %v2058_v15 = vadd.f32 %v3397_v4, %v1927_v48  ;;  %2998 = vmatmul.msk.bf16.gmra.mxu1 %vm989_vm0, %v2586_v1 }
 0x145   : > { %v1995_v52 = vadd.f32 %v3397_v4, %v1864_v51  ;;  %3031 = vmatmul.msk.bf16.gmra.mxu3 %vm989_vm0, %v2850_v19  ;;  %v3088_v19 = vld [vmem:[%s3269_s29 + $0x154] sm:$0xf] }
 0x146   : > { %v2186_v58 = vmax.f32 %v2058_v15, 0.0  ;;  %v2599_v15 = vld [vmem:[%s3269_s29 + $0x158] sm:$0xf0] }
 0x147   : > { %v2123_v24 = vmax.f32 %v1995_v52, 0.0  ;;  %v1398_v61 = vpop.f32.mrf.mxu2  ;;  %v2602_v17 = vor.u32 %v3088_v19, %v2599_v15 }
 0x148   : > { %2315 = vst.msk [vmem:[%s3410_s24 + $0x290] sm:$0xff] %vm2232_vm1, %v2186_v58  ;;  %v1728_v0 = vadd.f32 %v3655_v32, %v1398_v61  ;;  %v1241_v59 = vpop.f32.mrf.mxu0  ;;  %v3743_v60 = vpop.f32.mrf.mxu3  ;;  %v3154_v61 = vld [vmem:[%s3269_s29 + $0x364] sm:$0xf] }
 0x149   : > { %2252 = vst.msk [vmem:[%s3410_s24 + $0x98] sm:$0xff] %vm2232_vm1, %v2123_v24  ;;  %v1571_v26 = vadd.f32 %v3685_v34, %v1241_v59  ;;  %v1577_v3 = vpop.f32.mrf.mxu1 }
 0x14a   : > { %v1928_v7 = vmul.f32 %v3391_v63, %v1728_v0 }
 0x14b   : > { %v1865_v9 = vmul.f32 %v3391_v63, %v1571_v26  ;;  %1280 = vmatmul.bf16.gmra.mxu0 %v2574_v50  ;;  %v2863_v50 = vld [vmem:[%s3269_s29 + $0x368] sm:$0xf0] }
 0x14c   : > { %v2059_v10 = vadd.f32 %v3397_v4, %v1928_v7  ;;  %1440 = vmatmul.bf16.gmra.mxu2 %v2830_v2  ;;  %v2866_v26 = vor.u32 %v3154_v61, %v2863_v50  ;;  %v2589_v7 = vld [vmem:[%s3269_s29 + $0x140] sm:$0xf] }
 0x14d   : > { %v1996_v32 = vadd.f32 %v3397_v4, %v1865_v9  ;;  %v3087_v9 = vld [vmem:[%s3269_s29 + $0x144] sm:$0xf0] }
 0x14e   : > { %v2187_v14 = vmax.f32 %v2059_v10, 0.0  ;;  %v2845_v10 = vld [vmem:[%s3269_s29 + $0x340] sm:$0xf] }
 0x14f   : > { %v2124_v34 = vmax.f32 %v1996_v32, 0.0  ;;  %v1401_v16 = vpop.f32.mrf.mxu2  ;;  %v3151_v32 = vld [vmem:[%s3269_s29 + $0x344] sm:$0xf0] }
 0x150   : > { %2316 = vst.msk [vmem:[%s3410_s24 + $0x298] sm:$0xff] %vm2232_vm1, %v2187_v14  ;;  %v1731_v11 = vadd.f32 %v3673_v45, %v1401_v16  ;;  %v1243_v18 = vpop.f32.mrf.mxu0  ;;  %v3760_v21 = vpop.f32.mrf.mxu3 }
 0x151   : > { %2253 = vst.msk [vmem:[%s3410_s24 + $0xa0] sm:$0xff] %vm2232_vm1, %v2124_v34  ;;  %v1573_v20 = vadd.f32 %v1572_v29, %v1243_v18  ;;  %v3755_v47 = vpop.f32.mrf.mxu1  ;;  %v2590_v34 = vor.u32 %v3087_v9, %v2589_v7 }
 0x152   : > { %v1929_v25 = vmul.f32 %v3391_v63, %v1731_v11  ;;  %v2846_v11 = vor.u32 %v3151_v32, %v2845_v10 }
 0x153   : > { %v1866_v27 = vmul.f32 %v3391_v63, %v1573_v20 }
 0x154   : > { %v2060_v45 = vadd.f32 %v3397_v4, %v1929_v25  ;;  %2999 = vmatmul.msk.bf16.gmra.mxu1 %vm989_vm0, %v2594_v41  ;;  %v3819_v41 = vld [vmem:[%s4373_s2] ss:$0 sm:$0xff] }
 0x155   : > { %v1997_v29 = vadd.f32 %v3397_v4, %v1866_v27  ;;  %3032 = vmatmul.msk.bf16.gmra.mxu3 %vm989_vm0, %v2858_v49  ;;  %v3090_v27 = vld [vmem:[%s3269_s29 + $0x164] sm:$0xf]  ;;  %v2607_v49 = vld [vmem:[%s3269_s29 + $0x168] sm:$0xf0] }
 0x156   : > { %v2188_v35 = vmax.f32 %v2060_v45, 0.0  ;;  %v2610_v55 = vor.u32 %v3090_v27, %v2607_v49 }
 0x157   : > { %v2125_v62 = vmax.f32 %v1997_v29, 0.0  ;;  %v1403_v38 = vpop.f32.mrf.mxu2 }
 0x158   : > { %2317 = vst.msk [vmem:[%s3410_s24 + $0x2a0] sm:$0xff] %vm2232_vm1, %v2188_v35  ;;  %v1733_v40 = vadd.f32 %v3690_v5, %v1403_v38  ;;  %v1246_v36 = vpop.f32.mrf.mxu0  ;;  %v3780_v37 = vpop.f32.mrf.mxu3  ;;  %v3156_v38 = vld [vmem:[%s3269_s29 + $0x374] sm:$0xf] }
 0x159   : > { %2254 = vst.msk [vmem:[%s3410_s24 + $0xa8] sm:$0xff] %vm2232_vm1, %v2125_v62  ;;  %v1576_v1 = vadd.f32 %v3720_v8, %v1246_v36  ;;  %v3777_v43 = vpop.f32.mrf.mxu1 }
 0x15a   : > { %v1930_v46 = vmul.f32 %v3391_v63, %v1733_v40 }
 0x15b   : > { %v1867_v48 = vmul.f32 %v3391_v63, %v1576_v1  ;;  %1285 = vmatmul.bf16.gmra.mxu0 %v2582_v6  ;;  %v2871_v6 = vld [vmem:[%s3269_s29 + $0x378] sm:$0xf0] }
 0x15c   : > { %v2061_v5 = vadd.f32 %v3397_v4, %v1930_v46  ;;  %1445 = vmatmul.bf16.gmra.mxu2 %v2838_v42  ;;  %v2597_v46 = vld [vmem:[%s3269_s29 + $0x150] sm:$0xf] }
 0x15d   : > { %v1998_v51 = vadd.f32 %v3397_v4, %v1867_v48  ;;  %v3089_v48 = vld [vmem:[%s3269_s29 + $0x154] sm:$0xf0] }
 0x15e   : > { %v2189_v8 = vmax.f32 %v2061_v5, 0.0  ;;  %v2853_v5 = vld [vmem:[%s3269_s29 + $0x350] sm:$0xf] }
 0x15f   : > { %v2126_v53 = vmax.f32 %v1998_v51, 0.0  ;;  %v1406_v54 = vpop.f32.mrf.mxu2  ;;  %v3153_v51 = vld [vmem:[%s3269_s29 + $0x354] sm:$0xf0] }
 0x160   : > { %2318 = vst.msk [vmem:[%s3410_s24 + $0x2a8] sm:$0xff] %vm2232_vm1, %v2189_v8  ;;  %v1736_v52 = vadd.f32 %v3708_v22, %v1406_v54  ;;  %v1248_v56 = vpop.f32.mrf.mxu0  ;;  %v3797_v59 = vpop.f32.mrf.mxu3 }
 0x161   : > { %2255 = vst.msk [vmem:[%s3410_s24 + $0xb0] sm:$0xff] %vm2232_vm1, %v2126_v53  ;;  %v1578_v58 = vadd.f32 %v1577_v3, %v1248_v56  ;;  %v3792_v24 = vpop.f32.mrf.mxu1  ;;  %v2598_v53 = vor.u32 %v3089_v48, %v2597_v46  ;;  %v2854_v56 = vor.u32 %v3153_v51, %v2853_v5 }
 0x162   : > { %v1931_v0 = vmul.f32 %v3391_v63, %v1736_v52 }
 0x163   : > { %v1868_v2 = vmul.f32 %v3391_v63, %v1578_v58 }
 0x164   : > { %v2062_v22 = vadd.f32 %v3397_v4, %v1931_v0  ;;  %3000 = vmatmul.msk.bf16.gmra.mxu1 %vm989_vm0, %v2602_v17 }
 0x165   : > { %v1999_v3 = vadd.f32 %v3397_v4, %v1868_v2  ;;  %3033 = vmatmul.msk.bf16.gmra.mxu3 %vm989_vm0, %v2866_v26  ;;  %v3092_v26 = vld [vmem:[%s3269_s29 + $0x174] sm:$0xf] }
 0x166   : > { %v2190_v57 = vmax.f32 %v2062_v22, 0.0  ;;  %v2615_v22 = vld [vmem:[%s3269_s29 + $0x178] sm:$0xf0] }
 0x167   : > { %v2127_v39 = vmax.f32 %v1999_v3, 0.0  ;;  %v1408_v14 = vpop.f32.mrf.mxu2  ;;  %v2618_v32 = vor.u32 %v3092_v26, %v2615_v22 }
 0x168   : > { %2319 = vst.msk [vmem:[%s3410_s24 + $0x2b0] sm:$0xff] %vm2232_vm1, %v2190_v57  ;;  %v1738_v63 = vadd.f32 %v3725_v44, %v1408_v14  ;;  %v1251_v16 = vpop.f32.mrf.mxu0  ;;  %v3822_v23 = vpop.f32.mrf.mxu3  ;;  %v3158_v14 = vld [vmem:[%s3269_s29 + $0x384] sm:$0xf] }
 0x169   : > { %2256 = vst.msk [vmem:[%s3410_s24 + $0xb8] sm:$0xff] %vm2232_vm1, %v2127_v39  ;;  %v1581_v4 = vadd.f32 %v3755_v47, %v1251_v16  ;;  %v3814_v18 = vpop.f32.mrf.mxu1  ;;  %v3828_v47 = vld [vmem:[%s4374_s3] ss:$0 sm:$0xff] }
 0x16a   : > { %v1932_v20 = vmul.f32 %v3819_v41, %v1738_v63 }
 0x16b   : > { %v1869_v44 = vmul.f32 %v3819_v41, %v1581_v4  ;;  %1290 = vmatmul.bf16.gmra.mxu0 %v2590_v34  ;;  %v2879_v34 = vld [vmem:[%s3269_s29 + $0x388] sm:$0xf0] }
 0x16c   : > { %v2063_v13 = vadd.f32 %v3828_v47, %v1932_v20  ;;  %1450 = vmatmul.bf16.gmra.mxu2 %v2846_v11  ;;  %v2605_v20 = vld [vmem:[%s3269_s29 + $0x160] sm:$0xf] }
 0x16d   : > { %v2000_v25 = vadd.f32 %v3828_v47, %v1869_v44  ;;  %v3091_v44 = vld [vmem:[%s3269_s29 + $0x164] sm:$0xf0] }
 0x16e   : > { %v2191_v45 = vmax.f32 %v2063_v13, 0.0  ;;  %v2861_v13 = vld [vmem:[%s3269_s29 + $0x360] sm:$0xf] }
 0x16f   : > { %v2128_v30 = vmax.f32 %v2000_v25, 0.0  ;;  %v1411_v31 = vpop.f32.mrf.mxu2  ;;  %v3155_v25 = vld [vmem:[%s3269_s29 + $0x364] sm:$0xf0] }
 0x170   : > { %2320 = vst.msk [vmem:[%s3410_s24 + $0x2b8] sm:$0xff] %vm2232_vm1, %v2191_v45  ;;  %v1741_v29 = vadd.f32 %v3743_v60, %v1411_v31  ;;  %v1253_v33 = vpop.f32.mrf.mxu0  ;;  %v3845_v36 = vpop.f32.mrf.mxu3  ;;  %v2874_v60 = vor.u32 %v3156_v38, %v2871_v6 }
 0x171   : > { %2257 = vst.msk [vmem:[%s3410_s24 + $0xc0] sm:$0xff] %vm2232_vm1, %v2128_v30  ;;  %v1583_v35 = vadd.f32 %v3777_v43, %v1253_v33  ;;  %v3840_v62 = vpop.f32.mrf.mxu1  ;;  %v2606_v30 = vor.u32 %v3091_v44, %v2605_v20  ;;  %v2862_v33 = vor.u32 %v3155_v25, %v2861_v13 }
 0x172   : > { %v1933_v40 = vmul.f32 %v3819_v41, %v1741_v29 }
 0x173   : > { %v1870_v42 = vmul.f32 %v3819_v41, %v1583_v35 }
 0x174   : > { %v2064_v1 = vadd.f32 %v3828_v47, %v1933_v40  ;;  %3001 = vmatmul.msk.bf16.gmra.mxu1 %vm989_vm0, %v2610_v55 }
 0x175   : > { %v2001_v43 = vadd.f32 %v3828_v47, %v1870_v42  ;;  %3034 = vmatmul.msk.bf16.gmra.mxu3 %vm989_vm0, %v2874_v60  ;;  %v3094_v60 = vld [vmem:[%s3269_s29 + $0x184] sm:$0xf] }
 0x176   : > { %v2192_v19 = vmax.f32 %v2064_v1, 0.0  ;;  %v2623_v1 = vld [vmem:[%s3269_s29 + $0x188] sm:$0xf0] }
 0x177   : > { %v2129_v15 = vmax.f32 %v2001_v43, 0.0  ;;  %v1413_v8 = vpop.f32.mrf.mxu2  ;;  %v2626_v51 = vor.u32 %v3094_v60, %v2623_v1 }
 0x178   : > { %2321 = vst.msk [vmem:[%s3410_s24 + $0x2c0] sm:$0xff] %vm2232_vm1, %v2192_v19  ;;  %v1743_v54 = vadd.f32 %v3760_v21, %v1413_v8  ;;  %v1256_v52 = vpop.f32.mrf.mxu0  ;;  %v3863_v50 = vpop.f32.mrf.mxu3  ;;  %v3160_v8 = vld [vmem:[%s3269_s29 + $0x394] sm:$0xf] }
 0x179   : > { %2258 = vst.msk [vmem:[%s3410_s24 + $0xc8] sm:$0xff] %vm2232_vm1, %v2129_v15  ;;  %v1586_v17 = vadd.f32 %v3792_v24, %v1256_v52  ;;  %v1592_v58 = vpop.f32.mrf.mxu1 }
 0x17a   : > { %v1934_v61 = vmul.f32 %v3819_v41, %v1743_v54 }
 0x17b   : > { %v1871_v0 = vmul.f32 %v3819_v41, %v1586_v17  ;;  %1295 = vmatmul.bf16.gmra.mxu0 %v2598_v53  ;;  %v2887_v53 = vld [vmem:[%s3269_s29 + $0x398] sm:$0xf0] }
 0x17c   : > { %v2065_v2 = vadd.f32 %v3828_v47, %v1934_v61  ;;  %1455 = vmatmul.bf16.gmra.mxu2 %v2854_v56  ;;  %v2890_v17 = vor.u32 %v3160_v8, %v2887_v53  ;;  %v2613_v61 = vld [vmem:[%s3269_s29 + $0x170] sm:$0xf] }
 0x17d   : > { %v2002_v21 = vadd.f32 %v3828_v47, %v1871_v0  ;;  %v3093_v0 = vld [vmem:[%s3269_s29 + $0x174] sm:$0xf0] }
 0x17e   : > { %v2193_v7 = vmax.f32 %v2065_v2, 0.0  ;;  %v2869_v2 = vld [vmem:[%s3269_s29 + $0x370] sm:$0xf] }
 0x17f   : > { %v2130_v24 = vmax.f32 %v2002_v21, 0.0  ;;  %v1416_v9 = vpop.f32.mrf.mxu2  ;;  %v3157_v21 = vld [vmem:[%s3269_s29 + $0x374] sm:$0xf0] }
 0x180   : > { %2322 = vst.msk [vmem:[%s3410_s24 + $0x2c8] sm:$0xff] %vm2232_vm1, %v2193_v7  ;;  %v1746_v3 = vadd.f32 %v3780_v37, %v1416_v9  ;;  %v1258_v10 = vpop.f32.mrf.mxu0  ;;  %v3881_v16 = vpop.f32.mrf.mxu3  ;;  %v2882_v37 = vor.u32 %v3158_v14, %v2879_v34 }
 0x181   : > { %2259 = vst.msk [vmem:[%s3410_s24 + $0xd0] sm:$0xff] %vm2232_vm1, %v2130_v24  ;;  %v1588_v57 = vadd.f32 %v3814_v18, %v1258_v10  ;;  %v3876_v39 = vpop.f32.mrf.mxu1  ;;  %v2614_v24 = vor.u32 %v3093_v0, %v2613_v61  ;;  %v2870_v10 = vor.u32 %v3157_v21, %v2869_v2 }
 0x182   : > { %v1935_v63 = vmul.f32 %v3819_v41, %v1746_v3 }
 0x183   : > { %v1872_v11 = vmul.f32 %v3819_v41, %v1588_v57 }
 0x184   : > { %v2066_v4 = vadd.f32 %v3828_v47, %v1935_v63  ;;  %3002 = vmatmul.msk.bf16.gmra.mxu1 %vm989_vm0, %v2618_v32 }
 0x185   : > { %v2003_v18 = vadd.f32 %v3828_v47, %v1872_v11  ;;  %3035 = vmatmul.msk.bf16.gmra.mxu3 %vm989_vm0, %v2882_v37  ;;  %v3096_v37 = vld [vmem:[%s3269_s29 + $0x194] sm:$0xf] }
 0x186   : > { %v2194_v27 = vmax.f32 %v2066_v4, 0.0  ;;  %v2631_v4 = vld [vmem:[%s3269_s29 + $0x198] sm:$0xf0] }
 0x187   : > { %v2131_v49 = vmax.f32 %v2003_v18, 0.0  ;;  %v1418_v45 = vpop.f32.mrf.mxu2  ;;  %v2634_v25 = vor.u32 %v3096_v37, %v2631_v4 }
 0x188   : > { %2323 = vst.msk [vmem:[%s3410_s24 + $0x2d0] sm:$0xff] %vm2232_vm1, %v2194_v27  ;;  %v1748_v31 = vadd.f32 %v3797_v59, %v1418_v45  ;;  %v1261_v29 = vpop.f32.mrf.mxu0  ;;  %v3899_v6 = vpop.f32.mrf.mxu3  ;;  %v3162_v45 = vld [vmem:[%s3269_s29 + $0x3a4] sm:$0xf] }
 0x189   : > { %2260 = vst.msk [vmem:[%s3410_s24 + $0xd8] sm:$0xff] %vm2232_vm1, %v2131_v49  ;;  %v1591_v55 = vadd.f32 %v3840_v62, %v1261_v29  ;;  %v1597_v35 = vpop.f32.mrf.mxu1 }
 0x18a   : > { %v1936_v38 = vmul.f32 %v3819_v41, %v1748_v31 }
 0x18b   : > { %v1873_v40 = vmul.f32 %v3819_v41, %v1591_v55  ;;  %1300 = vmatmul.bf16.gmra.mxu0 %v2606_v30  ;;  %v2895_v30 = vld [vmem:[%s3269_s29 + $0x3a8] sm:$0xf0] }
 0x18c   : > { %v2067_v42 = vadd.f32 %v3828_v47, %v1936_v38  ;;  %1460 = vmatmul.bf16.gmra.mxu2 %v2862_v33  ;;  %v2898_v55 = vor.u32 %v3162_v45, %v2895_v30  ;;  %v2621_v38 = vld [vmem:[%s3269_s29 + $0x180] sm:$0xf] }
 0x18d   : > { %v2004_v59 = vadd.f32 %v3828_v47, %v1873_v40  ;;  %v3095_v40 = vld [vmem:[%s3269_s29 + $0x184] sm:$0xf0] }
 0x18e   : > { %v2195_v46 = vmax.f32 %v2067_v42, 0.0  ;;  %v2877_v42 = vld [vmem:[%s3269_s29 + $0x380] sm:$0xf] }
 0x18f   : > { %v2132_v62 = vmax.f32 %v2004_v59, 0.0  ;;  %v1421_v48 = vpop.f32.mrf.mxu2  ;;  %v3159_v59 = vld [vmem:[%s3269_s29 + $0x384] sm:$0xf0] }
 0x190   : > { %2324 = vst.msk [vmem:[%s3410_s24 + $0x2d8] sm:$0xff] %vm2232_vm1, %v2195_v46  ;;  %v1751_v43 = vadd.f32 %v3822_v23, %v1421_v48  ;;  %v1263_v5 = vpop.f32.mrf.mxu0  ;;  %v3916_v52 = vpop.f32.mrf.mxu3 }
 0x191   : > { %2261 = vst.msk [vmem:[%s3410_s24 + $0xe0] sm:$0xff] %vm2232_vm1, %v2132_v62  ;;  %v1593_v19 = vadd.f32 %v1592_v58, %v1263_v5  ;;  %v3911_v15 = vpop.f32.mrf.mxu1  ;;  %v2622_v62 = vor.u32 %v3095_v40, %v2621_v38  ;;  %v2878_v5 = vor.u32 %v3159_v59, %v2877_v42 }
 0x192   : > { %v1937_v54 = vmul.f32 %v3819_v41, %v1751_v43 }
 0x193   : > { %v1874_v56 = vmul.f32 %v3819_v41, %v1593_v19 }
 0x194   : > { %v2068_v23 = vadd.f32 %v3828_v47, %v1937_v54  ;;  %3003 = vmatmul.msk.bf16.gmra.mxu1 %vm989_vm0, %v2626_v51 }
 0x195   : > { %v2005_v58 = vadd.f32 %v3828_v47, %v1874_v56  ;;  %3036 = vmatmul.msk.bf16.gmra.mxu3 %vm989_vm0, %v2890_v17  ;;  %v3098_v17 = vld [vmem:[%s3269_s29 + $0x1a4] sm:$0xf] }
 0x196   : > { %v2196_v26 = vmax.f32 %v2068_v23, 0.0  ;;  %v2639_v23 = vld [vmem:[%s3269_s29 + $0x1a8] sm:$0xf0] }
 0x197   : > { %v2133_v22 = vmax.f32 %v2005_v58, 0.0  ;;  %v1423_v7 = vpop.f32.mrf.mxu2  ;;  %v2642_v21 = vor.u32 %v3098_v17, %v2639_v23 }
 0x198   : > { %2325 = vst.msk [vmem:[%s3410_s24 + $0x2e0] sm:$0xff] %vm2232_vm1, %v2196_v26  ;;  %v1753_v9 = vadd.f32 %v3845_v36, %v1423_v7  ;;  %v1266_v3 = vpop.f32.mrf.mxu0  ;;  %v3934_v34 = vpop.f32.mrf.mxu3  ;;  %v3164_v7 = vld [vmem:[%s3269_s29 + $0x3b4] sm:$0xf] }
 0x199   : > { %2262 = vst.msk [vmem:[%s3410_s24 + $0xe8] sm:$0xff] %vm2232_vm1, %v2133_v22  ;;  %v1596_v32 = vadd.f32 %v3876_v39, %v1266_v3  ;;  %v1602_v57 = vpop.f32.mrf.mxu1 }
 0x19a   : > { %v1938_v14 = vmul.f32 %v3819_v41, %v1753_v9 }
 0x19b   : > { %v1875_v63 = vmul.f32 %v3819_v41, %v1596_v32  ;;  %1305 = vmatmul.bf16.gmra.mxu0 %v2614_v24  ;;  %v2903_v24 = vld [vmem:[%s3269_s29 + $0x3b8] sm:$0xf0] }
 0x19c   : > { %v2069_v11 = vadd.f32 %v3828_v47, %v1938_v14  ;;  %1465 = vmatmul.bf16.gmra.mxu2 %v2870_v10  ;;  %v2906_v32 = vor.u32 %v3164_v7, %v2903_v24  ;;  %v2629_v14 = vld [vmem:[%s3269_s29 + $0x190] sm:$0xf] }
 0x19d   : > { %v2006_v36 = vadd.f32 %v3828_v47, %v1875_v63  ;;  %v3097_v63 = vld [vmem:[%s3269_s29 + $0x194] sm:$0xf0] }
 0x19e   : > { %v2197_v20 = vmax.f32 %v2069_v11, 0.0  ;;  %v2885_v11 = vld [vmem:[%s3269_s29 + $0x390] sm:$0xf] }
 0x19f   : > { %v2134_v39 = vmax.f32 %v2006_v36, 0.0  ;;  %v1426_v44 = vpop.f32.mrf.mxu2  ;;  %v3161_v36 = vld [vmem:[%s3269_s29 + $0x394] sm:$0xf0] }
 0x1a0   : > { %2326 = vst.msk [vmem:[%s3410_s24 + $0x2e8] sm:$0xff] %vm2232_vm1, %v2197_v20  ;;  %v1756_v18 = vadd.f32 %v3863_v50, %v1426_v44  ;;  %v1268_v13 = vpop.f32.mrf.mxu0  ;;  %v3951_v29 = vpop.f32.mrf.mxu3 }
 0x1a1   : > { %2263 = vst.msk [vmem:[%s3410_s24 + $0xf0] sm:$0xff] %vm2232_vm1, %v2134_v39  ;;  %v1598_v27 = vadd.f32 %v1597_v35, %v1268_v13  ;;  %v3946_v49 = vpop.f32.mrf.mxu1  ;;  %v2630_v39 = vor.u32 %v3097_v63, %v2629_v14  ;;  %v2886_v13 = vor.u32 %v3161_v36, %v2885_v11 }
 0x1a2   : > { %v1939_v31 = vmul.f32 %v3819_v41, %v1756_v18 }
 0x1a3   : > { %v1876_v33 = vmul.f32 %v3819_v41, %v1598_v27 }
 0x1a4   : > { %v2070_v50 = vadd.f32 %v3828_v47, %v1939_v31  ;;  %3004 = vmatmul.msk.bf16.gmra.mxu1 %vm989_vm0, %v2634_v25 }
 0x1a5   : > { %v2007_v35 = vadd.f32 %v3828_v47, %v1876_v33  ;;  %3037 = vmatmul.msk.bf16.gmra.mxu3 %vm989_vm0, %v2898_v55  ;;  %v3100_v55 = vld [vmem:[%s3269_s29 + $0x1b4] sm:$0xf] }
 0x1a6   : > { %v2198_v60 = vmax.f32 %v2070_v50, 0.0  ;;  %v2647_v50 = vld [vmem:[%s3269_s29 + $0x1b8] sm:$0xf0] }
 0x1a7   : > { %v2135_v1 = vmax.f32 %v2007_v35, 0.0  ;;  %v1428_v46 = vpop.f32.mrf.mxu2  ;;  %v2650_v59 = vor.u32 %v3100_v55, %v2647_v50 }
 0x1a8   : > { %2327 = vst.msk [vmem:[%s3410_s24 + $0x2f0] sm:$0xff] %vm2232_vm1, %v2198_v60  ;;  %v1758_v48 = vadd.f32 %v3881_v16, %v1428_v46  ;;  %v1271_v43 = vpop.f32.mrf.mxu0  ;;  %v3969_v53 = vpop.f32.mrf.mxu3  ;;  %v3166_v46 = vld [vmem:[%s3269_s29 + $0x3c4] sm:$0xf] }
 0x1a9   : > { %2264 = vst.msk [vmem:[%s3410_s24 + $0xf8] sm:$0xff] %vm2232_vm1, %v2135_v1  ;;  %v1601_v51 = vadd.f32 %v3911_v15, %v1271_v43  ;;  %v1607_v19 = vpop.f32.mrf.mxu1 }
 0x1aa   : > { %v1940_v8 = vmul.f32 %v3819_v41, %v1758_v48 }
 0x1ab   : > { %v1877_v54 = vmul.f32 %v3819_v41, %v1601_v51  ;;  %1310 = vmatmul.bf16.gmra.mxu0 %v2622_v62  ;;  %v2911_v62 = vld [vmem:[%s3269_s29 + $0x3c8] sm:$0xf0] }
 0x1ac   : > { %v2071_v56 = vadd.f32 %v3828_v47, %v1940_v8  ;;  %1470 = vmatmul.bf16.gmra.mxu2 %v2878_v5  ;;  %v2914_v51 = vor.u32 %v3166_v46, %v2911_v62  ;;  %v2637_v8 = vld [vmem:[%s3269_s29 + $0x1a0] sm:$0xf] }
 0x1ad   : > { %v2008_v16 = vadd.f32 %v3828_v47, %v1877_v54  ;;  %v3099_v54 = vld [vmem:[%s3269_s29 + $0x1a4] sm:$0xf0] }
 0x1ae   : > { %v2199_v61 = vmax.f32 %v2071_v56, 0.0  ;;  %v2893_v56 = vld [vmem:[%s3269_s29 + $0x3a0] sm:$0xf] }
 0x1af   : > { %v2136_v15 = vmax.f32 %v2008_v16, 0.0  ;;  %v1431_v0 = vpop.f32.mrf.mxu2  ;;  %v3163_v16 = vld [vmem:[%s3269_s29 + $0x3a4] sm:$0xf0] }
 0x1b0   : > { %2328 = vst.msk [vmem:[%s3410_s24 + $0x2f8] sm:$0xff] %vm2232_vm1, %v2199_v61  ;;  %v1761_v58 = vadd.f32 %v3899_v6, %v1431_v0  ;;  %v1273_v2 = vpop.f32.mrf.mxu0  ;;  %v3986_v3 = vpop.f32.mrf.mxu3 }
 0x1b1   : > { %2265 = vst.msk [vmem:[%s3410_s24 + $0x100] sm:$0xff] %vm2232_vm1, %v2136_v15  ;;  %v1603_v26 = vadd.f32 %v1602_v57, %v1273_v2  ;;  %v3981_v22 = vpop.f32.mrf.mxu1  ;;  %v2638_v15 = vor.u32 %v3099_v54, %v2637_v8  ;;  %v2894_v2 = vor.u32 %v3163_v16, %v2893_v56 }
 0x1b2   : > { %v1941_v9 = vmul.f32 %v3819_v41, %v1761_v58 }
 0x1b3   : > { %v1878_v10 = vmul.f32 %v3819_v41, %v1603_v26 }
 0x1b4   : > { %v2072_v6 = vadd.f32 %v3828_v47, %v1941_v9  ;;  %3005 = vmatmul.msk.bf16.gmra.mxu1 %vm989_vm0, %v2642_v21 }
 0x1b5   : > { %v2009_v57 = vadd.f32 %v3828_v47, %v1878_v10  ;;  %3038 = vmatmul.msk.bf16.gmra.mxu3 %vm989_vm0, %v2906_v32  ;;  %v3102_v32 = vld [vmem:[%s3269_s29 + $0x1c4] sm:$0xf] }
 0x1b6   : > { %v2200_v37 = vmax.f32 %v2072_v6, 0.0  ;;  %v2655_v6 = vld [vmem:[%s3269_s29 + $0x1c8] sm:$0xf0] }
 0x1b7   : > { %v2137_v4 = vmax.f32 %v2009_v57, 0.0  ;;  %v1433_v20 = vpop.f32.mrf.mxu2  ;;  %v2658_v36 = vor.u32 %v3102_v32, %v2655_v6 }
 0x1b8   : > { %2329 = vst.msk [vmem:[%s3410_s24 + $0x300] sm:$0xff] %vm2232_vm1, %v2200_v37  ;;  %v1763_v44 = vadd.f32 %v3916_v52, %v1433_v20  ;;  %v1276_v18 = vpop.f32.mrf.mxu0  ;;  %v4004_v30 = vpop.f32.mrf.mxu3  ;;  %v3168_v20 = vld [vmem:[%s3269_s29 + $0x3d4] sm:$0xf] }
 0x1b9   : > { %2266 = vst.msk [vmem:[%s3410_s24 + $0x108] sm:$0xff] %vm2232_vm1, %v2137_v4  ;;  %v1606_v25 = vadd.f32 %v3946_v49, %v1276_v18  ;;  %v1612_v27 = vpop.f32.mrf.mxu1 }
 0x1ba   : > { %v1942_v45 = vmul.f32 %v3819_v41, %v1763_v44 }
 0x1bb   : > { %v1879_v31 = vmul.f32 %v3819_v41, %v1606_v25  ;;  %1315 = vmatmul.bf16.gmra.mxu0 %v2630_v39  ;;  %v2919_v39 = vld [vmem:[%s3269_s29 + $0x3d8] sm:$0xf0] }
 0x1bc   : > { %v2073_v33 = vadd.f32 %v3828_v47, %v1942_v45  ;;  %1475 = vmatmul.bf16.gmra.mxu2 %v2886_v13  ;;  %v2922_v25 = vor.u32 %v3168_v20, %v2919_v39  ;;  %v2645_v45 = vld [vmem:[%s3269_s29 + $0x1b0] sm:$0xf] }
 0x1bd   : > { %v2010_v52 = vadd.f32 %v3828_v47, %v1879_v31  ;;  %v3101_v31 = vld [vmem:[%s3269_s29 + $0x1b4] sm:$0xf0] }
 0x1be   : > { %v2201_v38 = vmax.f32 %v2073_v33, 0.0  ;;  %v2901_v33 = vld [vmem:[%s3269_s29 + $0x3b0] sm:$0xf] }
 0x1bf   : > { %v2138_v49 = vmax.f32 %v2010_v52, 0.0  ;;  %v1436_v40 = vpop.f32.mrf.mxu2  ;;  %v3165_v52 = vld [vmem:[%s3269_s29 + $0x3b4] sm:$0xf0] }
 0x1c0   : > { %2330 = vst.msk [vmem:[%s3410_s24 + $0x308] sm:$0xff] %vm2232_vm1, %v2201_v38  ;;  %v1766_v35 = vadd.f32 %v3934_v34, %v1436_v40  ;;  %v1278_v42 = vpop.f32.mrf.mxu0  ;;  %v4021_v43 = vpop.f32.mrf.mxu3 }
 0x1c1   : > { %2267 = vst.msk [vmem:[%s3410_s24 + $0x110] sm:$0xff] %vm2232_vm1, %v2138_v49  ;;  %v1608_v60 = vadd.f32 %v1607_v19, %v1278_v42  ;;  %v4016_v1 = vpop.f32.mrf.mxu1  ;;  %v2646_v49 = vor.u32 %v3101_v31, %v2645_v45  ;;  %v2902_v42 = vor.u32 %v3165_v52, %v2901_v33 }
 0x1c2   : > { %v1943_v48 = vmul.f32 %v3819_v41, %v1766_v35 }
 0x1c3   : > { %v1880_v5 = vmul.f32 %v3819_v41, %v1608_v60 }
 0x1c4   : > { %v2074_v34 = vadd.f32 %v3828_v47, %v1943_v48  ;;  %3006 = vmatmul.msk.bf16.gmra.mxu1 %vm989_vm0, %v2650_v59 }
 0x1c5   : > { %v2011_v19 = vadd.f32 %v3828_v47, %v1880_v5  ;;  %3039 = vmatmul.msk.bf16.gmra.mxu3 %vm989_vm0, %v2914_v51  ;;  %v3104_v51 = vld [vmem:[%s3269_s29 + $0x1d4] sm:$0xf] }
 0x1c6   : > { %v2202_v17 = vmax.f32 %v2074_v34, 0.0  ;;  %v2663_v34 = vld [vmem:[%s3269_s29 + $0x1d8] sm:$0xf0] }
 0x1c7   : > { %v2139_v23 = vmax.f32 %v2011_v19, 0.0  ;;  %v1438_v61 = vpop.f32.mrf.mxu2  ;;  %v2666_v16 = vor.u32 %v3104_v51, %v2663_v34 }
 0x1c8   : > { %2331 = vst.msk [vmem:[%s3410_s24 + $0x310] sm:$0xff] %vm2232_vm1, %v2202_v17  ;;  %v1768_v0 = vadd.f32 %v3951_v29, %v1438_v61  ;;  %v1281_v58 = vpop.f32.mrf.mxu0  ;;  %v4039_v24 = vpop.f32.mrf.mxu3  ;;  %v3170_v61 = vld [vmem:[%s3269_s29 + $0x3e4] sm:$0xf] }
 0x1c9   : > { %2268 = vst.msk [vmem:[%s3410_s24 + $0x118] sm:$0xff] %vm2232_vm1, %v2139_v23  ;;  %v1611_v21 = vadd.f32 %v3981_v22, %v1281_v58  ;;  %v1617_v26 = vpop.f32.mrf.mxu1 }
 0x1ca   : > { %v1944_v7 = vmul.f32 %v3819_v41, %v1768_v0 }
 0x1cb   : > { %v1881_v9 = vmul.f32 %v3819_v41, %v1611_v21  ;;  %1320 = vmatmul.bf16.gmra.mxu0 %v2638_v15  ;;  %v2927_v15 = vld [vmem:[%s3269_s29 + $0x3e8] sm:$0xf0] }
 0x1cc   : > { %v2075_v10 = vadd.f32 %v3828_v47, %v1944_v7  ;;  %1480 = vmatmul.bf16.gmra.mxu2 %v2894_v2  ;;  %v2930_v21 = vor.u32 %v3170_v61, %v2927_v15  ;;  %v2653_v7 = vld [vmem:[%s3269_s29 + $0x1c0] sm:$0xf] }
 0x1cd   : > { %v2012_v29 = vadd.f32 %v3828_v47, %v1881_v9  ;;  %v3103_v9 = vld [vmem:[%s3269_s29 + $0x1c4] sm:$0xf0] }
 0x1ce   : > { %v2203_v14 = vmax.f32 %v2075_v10, 0.0  ;;  %v2909_v10 = vld [vmem:[%s3269_s29 + $0x3c0] sm:$0xf] }
 0x1cf   : > { %v2140_v22 = vmax.f32 %v2012_v29, 0.0  ;;  %v1441_v63 = vpop.f32.mrf.mxu2  ;;  %v3167_v29 = vld [vmem:[%s3269_s29 + $0x3c4] sm:$0xf0] }
 0x1d0   : > { %2332 = vst.msk [vmem:[%s3410_s24 + $0x318] sm:$0xff] %vm2232_vm1, %v2203_v14  ;;  %v1771_v57 = vadd.f32 %v3969_v53, %v1441_v63  ;;  %v1283_v11 = vpop.f32.mrf.mxu0  ;;  %v4056_v18 = vpop.f32.mrf.mxu3 }
 0x1d1   : > { %2269 = vst.msk [vmem:[%s3410_s24 + $0x120] sm:$0xff] %vm2232_vm1, %v2140_v22  ;;  %v1613_v37 = vadd.f32 %v1612_v27, %v1283_v11  ;;  %v4051_v4 = vpop.f32.mrf.mxu1  ;;  %v2654_v22 = vor.u32 %v3103_v9, %v2653_v7  ;;  %v2910_v11 = vor.u32 %v3167_v29, %v2909_v10 }
 0x1d2   : > { %v1945_v44 = vmul.f32 %v3819_v41, %v1771_v57 }
 0x1d3   : > { %v1882_v13 = vmul.f32 %v3819_v41, %v1613_v37 }
 0x1d4   : > { %v2076_v53 = vadd.f32 %v3828_v47, %v1945_v44  ;;  %3007 = vmatmul.msk.bf16.gmra.mxu1 %vm989_vm0, %v2658_v36 }
 0x1d5   : > { %v2013_v27 = vadd.f32 %v3828_v47, %v1882_v13  ;;  %3040 = vmatmul.msk.bf16.gmra.mxu3 %vm989_vm0, %v2922_v25  ;;  %v3106_v25 = vld [vmem:[%s3269_s29 + $0x1e4] sm:$0xf] }
 0x1d6   : > { %v2204_v55 = vmax.f32 %v2076_v53, 0.0  ;;  %v2671_v53 = vld [vmem:[%s3269_s29 + $0x1e8] sm:$0xf0] }
 0x1d7   : > { %v2141_v50 = vmax.f32 %v2013_v27, 0.0  ;;  %v1443_v38 = vpop.f32.mrf.mxu2  ;;  %v2674_v52 = vor.u32 %v3106_v25, %v2671_v53 }
 0x1d8   : > { %2333 = vst.msk [vmem:[%s3410_s24 + $0x320] sm:$0xff] %vm2232_vm1, %v2204_v55  ;;  %v1773_v40 = vadd.f32 %v3986_v3, %v1443_v38  ;;  %v1286_v35 = vpop.f32.mrf.mxu0  ;;  %v4074_v62 = vpop.f32.mrf.mxu3  ;;  %v3172_v38 = vld [vmem:[%s3269_s29 + $0x3f4] sm:$0xf] }
 0x1d9   : > { %2270 = vst.msk [vmem:[%s3410_s24 + $0x128] sm:$0xff] %vm2232_vm1, %v2141_v50  ;;  %v1616_v59 = vadd.f32 %v4016_v1, %v1286_v35  ;;  %v1622_v60 = vpop.f32.mrf.mxu1 }
 0x1da   : > { %v1946_v46 = vmul.f32 %v3819_v41, %v1773_v40 }
 0x1db   : > { %v1883_v48 = vmul.f32 %v3819_v41, %v1616_v59  ;;  %1325 = vmatmul.bf16.gmra.mxu0 %v2646_v49  ;;  %v2935_v49 = vld [vmem:[%s3269_s29 + $0x3f8] sm:$0xf0] }
 0x1dc   : > { %v2077_v5 = vadd.f32 %v3828_v47, %v1946_v46  ;;  %1485 = vmatmul.bf16.gmra.mxu2 %v2902_v42  ;;  %v2938_v59 = vor.u32 %v3172_v38, %v2935_v49  ;;  %v2661_v46 = vld [vmem:[%s3269_s29 + $0x1d0] sm:$0xf]  ;;  %v2687_v49 = vld [vmem:[%s3269_s29 + $0x208] sm:$0xf0] }
 0x1dd   : > { %v2014_v3 = vadd.f32 %v3828_v47, %v1883_v48  ;;  %v3105_v48 = vld [vmem:[%s3269_s29 + $0x1d4] sm:$0xf0] }
 0x1de   : > { %v2205_v8 = vmax.f32 %v2077_v5, 0.0  ;;  %v2917_v5 = vld [vmem:[%s3269_s29 + $0x3d0] sm:$0xf] }
 0x1df   : > { %v2142_v1 = vmax.f32 %v2014_v3, 0.0  ;;  %v1446_v54 = vpop.f32.mrf.mxu2  ;;  %v3169_v3 = vld [vmem:[%s3269_s29 + $0x3d4] sm:$0xf0] }
 0x1e0   : > { %2334 = vst.msk [vmem:[%s3410_s24 + $0x328] sm:$0xff] %vm2232_vm1, %v2205_v8  ;;  %v1776_v19 = vadd.f32 %v4004_v30, %v1446_v54  ;;  %v1288_v56 = vpop.f32.mrf.mxu0  ;;  %v4091_v58 = vpop.f32.mrf.mxu3 }
 0x1e1   : > { %2271 = vst.msk [vmem:[%s3410_s24 + $0x130] sm:$0xff] %vm2232_vm1, %v2142_v1  ;;  %v1618_v17 = vadd.f32 %v1617_v26, %v1288_v56  ;;  %v4086_v23 = vpop.f32.mrf.mxu1  ;;  %v2662_v1 = vor.u32 %v3105_v48, %v2661_v46  ;;  %v2918_v56 = vor.u32 %v3169_v3, %v2917_v5 }
 0x1e2   : > { %v1947_v0 = vmul.f32 %v3819_v41, %v1776_v19 }
 0x1e3   : > { %v1884_v2 = vmul.f32 %v3819_v41, %v1618_v17 }
 0x1e4   : > { %v2078_v30 = vadd.f32 %v3828_v47, %v1947_v0  ;;  %3008 = vmatmul.msk.bf16.gmra.mxu1 %vm989_vm0, %v2666_v16 }
 0x1e5   : > { %v2015_v26 = vadd.f32 %v3828_v47, %v1884_v2  ;;  %3041 = vmatmul.msk.bf16.gmra.mxu3 %vm989_vm0, %v2930_v21  ;;  %v2679_v21 = vld [vmem:[%s3269_s29 + $0x1f8] sm:$0xf0] }
 0x1e6   : > { %v2206_v32 = vmax.f32 %v2078_v30, 0.0 }
 0x1e7   : > { %v2143_v6 = vmax.f32 %v2015_v26, 0.0  ;;  %v1448_v14 = vpop.f32.mrf.mxu2 }
 0x1e8   : > { %2335 = vst.msk [vmem:[%s3410_s24 + $0x330] sm:$0xff] %vm2232_vm1, %v2206_v32  ;;  %v1778_v63 = vadd.f32 %v4021_v43, %v1448_v14  ;;  %v1291_v57 = vpop.f32.mrf.mxu0  ;;  %v4109_v39 = vpop.f32.mrf.mxu3 }
 0x1e9   : > { %2272 = vst.msk [vmem:[%s3410_s24 + $0x138] sm:$0xff] %vm2232_vm1, %v2143_v6  ;;  %v1621_v36 = vadd.f32 %v4051_v4, %v1291_v57  ;;  %v1627_v37 = vpop.f32.mrf.mxu1  ;;  %v2669_v57 = vld [vmem:[%s3269_s29 + $0x1e0] sm:$0xf] }
 0x1ea   : > { %v1948_v20 = vmul.f32 %v3819_v41, %v1778_v63 }
 0x1eb   : > { %v1885_v44 = vmul.f32 %v3819_v41, %v1621_v36  ;;  %1330 = vmatmul.bf16.gmra.mxu0 %v2654_v22  ;;  %v2925_v36 = vld [vmem:[%s3269_s29 + $0x3e0] sm:$0xf] }
 0x1ec   : > { %v2079_v13 = vadd.f32 %v3828_v47, %v1948_v20  ;;  %1490 = vmatmul.bf16.gmra.mxu2 %v2910_v11  ;;  %v3107_v11 = vld [vmem:[%s3269_s29 + $0x1e4] sm:$0xf0] }
 0x1ed   : > { %v2016_v43 = vadd.f32 %v3828_v47, %v1885_v44  ;;  %v3171_v20 = vld [vmem:[%s3269_s29 + $0x3e4] sm:$0xf0] }
 0x1ee   : > { %v2207_v45 = vmax.f32 %v2079_v13, 0.0 }
 0x1ef   : > { %v2144_v4 = vmax.f32 %v2016_v43, 0.0  ;;  %v1451_v31 = vpop.f32.mrf.mxu2  ;;  %v2670_v43 = vor.u32 %v3107_v11, %v2669_v57 }
 0x1f0   : > { %2336 = vst.msk [vmem:[%s3410_s24 + $0x338] sm:$0xff] %vm2232_vm1, %v2207_v45  ;;  %v1781_v27 = vadd.f32 %v4039_v24, %v1451_v31  ;;  %v1293_v33 = vpop.f32.mrf.mxu0  ;;  %v4127_v42 = vpop.f32.mrf.mxu3 }
 0x1f1   : > { %2273 = vst.msk [vmem:[%s3410_s24 + $0x140] sm:$0xff] %vm2232_vm1, %v2144_v4  ;;  %v1623_v55 = vadd.f32 %v1622_v60, %v1293_v33  ;;  %v4121_v50 = vpop.f32.mrf.mxu1  ;;  %v2926_v4 = vor.u32 %v3171_v20, %v2925_v36 }
 0x1f2   : > { %v1949_v40 = vmul.f32 %v3819_v41, %v1781_v27 }
 0x1f3   : > { %v1886_v35 = vmul.f32 %v3819_v41, %v1623_v55 }
 0x1f4   : > { %v2080_v24 = vadd.f32 %v3828_v47, %v1949_v40  ;;  %3009 = vmatmul.msk.bf16.gmra.mxu1 %vm989_vm0, %v2674_v52 }
 0x1f5   : > { %v2017_v60 = vadd.f32 %v3828_v47, %v1886_v35  ;;  %3042 = vmatmul.msk.bf16.gmra.mxu3 %vm989_vm0, %v2938_v59 }
 0x1f6   : > { %v2208_v51 = vmax.f32 %v2080_v24, 0.0 }
 0x1f7   : > { %v2145_v34 = vmax.f32 %v2017_v60, 0.0  ;;  %v1453_v8 = vpop.f32.mrf.mxu2 }
 0x1f8   : > { %2337 = vst.msk [vmem:[%s3410_s24 + $0x340] sm:$0xff] %vm2232_vm1, %v2208_v51  ;;  %v1783_v54 = vadd.f32 %v4056_v18, %v1453_v8  ;;  %v1296_v19 = vpop.f32.mrf.mxu0  ;;  %v3108_v18 = vld [vmem:[%s3269_s29 + $0x1f4] sm:$0xf]  ;;  %v4149_v30 = vpop.f32.mrf.mxu3  ;;  %v2677_v8 = vld [vmem:[%s3269_s29 + $0x1f0] sm:$0xf] }
 0x1f9   : > { %2274 = vst.msk [vmem:[%s3410_s24 + $0x148] sm:$0xff] %vm2232_vm1, %v2145_v34  ;;  %v1626_v16 = vadd.f32 %v4086_v23, %v1296_v19  ;;  %v1632_v17 = vpop.f32.mrf.mxu1  ;;  %v2682_v29 = vor.u32 %v3108_v18, %v2679_v21  ;;  %v3173_v19 = vld [vmem:[%s3269_s29 + $0x3f4] sm:$0xf0] }
 0x1fa   : > { %v1950_v61 = vmul.f32 %v3819_v41, %v1783_v54  ;;  %v2933_v54 = vld [vmem:[%s3269_s29 + $0x3f0] sm:$0xf] }
 0x1fb   : > { %v1887_v15 = vmul.f32 %v3819_v41, %v1626_v16  ;;  %1335 = vmatmul.bf16.gmra.mxu0 %v2662_v1  ;;  %v3109_v1 = vld [vmem:[%s3269_s29 + $0x1f4] sm:$0xf0] }
 0x1fc   : > { %v2081_v0 = vadd.f32 %v3828_v47, %v1950_v61  ;;  %1495 = vmatmul.bf16.gmra.mxu2 %v2918_v56  ;;  %v2678_v61 = vor.u32 %v3109_v1, %v2677_v8 }
 0x1fd   : > { %v2018_v2 = vadd.f32 %v3828_v47, %v1887_v15 }
 0x1fe   : > { %v2209_v7 = vmax.f32 %v2081_v0, 0.0 }
 0x1ff   : > { %v2146_v23 = vmax.f32 %v2018_v2, 0.0  ;;  %v1456_v9 = vpop.f32.mrf.mxu2  ;;  %v2934_v2 = vor.u32 %v3173_v19, %v2933_v54 }
 0x200   : > { %2338 = vst.msk [vmem:[%s3410_s24 + $0x348] sm:$0xff] %vm2232_vm1, %v2209_v7  ;;  %v1786_v26 = vadd.f32 %v4074_v62, %v1456_v9  ;;  %v1298_v10 = vpop.f32.mrf.mxu0  ;;  %v4165_v25 = vpop.f32.mrf.mxu3 }
 0x201   : > { %2275 = vst.msk [vmem:[%s3410_s24 + $0x150] sm:$0xff] %vm2232_vm1, %v2146_v23  ;;  %v1628_v32 = vadd.f32 %v1627_v37, %v1298_v10  ;;  %v1635_v6 = vpop.f32.mrf.mxu1 }
 0x202   : > { %v1951_v14 = vmul.f32 %v3819_v41, %v1786_v26 }
 0x203   : > { %v1888_v22 = vmul.f32 %v3819_v41, %v1628_v32 }
 0x204   : > { %v2082_v63 = vadd.f32 %v3828_v47, %v1951_v14  ;;  %3010 = vmatmul.msk.bf16.gmra.mxu1 %vm989_vm0, %v2682_v29 }
 0x205   : > { %v2019_v62 = vadd.f32 %v3828_v47, %v1888_v22 }
 0x206   : > { %v2210_v44 = vmax.f32 %v2082_v63, 0.0 }
 0x207   : > { %v2147_v13 = vmax.f32 %v2019_v62, 0.0  ;;  %v1458_v37 = vpop.f32.mrf.mxu2 }
 0x208   : > { %2339 = vst.msk [vmem:[%s3410_s24 + $0x350] sm:$0xff] %vm2232_vm1, %v2210_v44  ;;  %v1788_v53 = vadd.f32 %v4091_v58, %v1458_v37  ;;  %v1301_v45 = vpop.f32.mrf.mxu0  ;;  %v3110_v58 = vld [vmem:[%s3269_s29 + $0x204] sm:$0xf]  ;;  %v1800_v5 = vpop.f32.mrf.mxu3 }
 0x209   : > { %2276 = vst.msk [vmem:[%s3410_s24 + $0x158] sm:$0xff] %vm2232_vm1, %v2147_v13  ;;  %v1631_v31 = vadd.f32 %v4121_v50, %v1301_v45  ;;  %v1637_v27 = vpop.f32.mrf.mxu1  ;;  %v2690_v46 = vor.u32 %v3110_v58, %v2687_v49 }
 0x20a   : > { %v1952_v33 = vmul.f32 %v3819_v41, %v1788_v53 }
 0x20b   : > { %v1889_v52 = vmul.f32 %v3819_v41, %v1631_v31  ;;  %1340 = vmatmul.bf16.gmra.mxu0 %v2670_v43 }
 0x20c   : > { %v2083_v55 = vadd.f32 %v3828_v47, %v1952_v33  ;;  %1500 = vmatmul.bf16.gmra.mxu2 %v2926_v4 }
 0x20d   : > { %v2020_v38 = vadd.f32 %v3828_v47, %v1889_v52 }
 0x20e   : > { %v2211_v40 = vmax.f32 %v2083_v55, 0.0 }
 0x20f   : > { %v2148_v35 = vmax.f32 %v2020_v38, 0.0  ;;  %v1461_v59 = vpop.f32.mrf.mxu2 }
 0x210   : > { %2340 = vst.msk [vmem:[%s3410_s24 + $0x358] sm:$0xff] %vm2232_vm1, %v2211_v40  ;;  %v1791_v50 = vadd.f32 %v4109_v39, %v1461_v59  ;;  %v1303_v24 = vpop.f32.mrf.mxu0  ;;  %v1802_v9 = vpop.f32.mrf.mxu3 }
 0x211   : > { %2277 = vst.msk [vmem:[%s3410_s24 + $0x160] sm:$0xff] %vm2232_vm1, %v2148_v35  ;;  %v1633_v48 = vadd.f32 %v1632_v17, %v1303_v24  ;;  %v1640_v60 = vpop.f32.mrf.mxu1 }
 0x212   : > { %v1953_v3 = vmul.f32 %v3819_v41, %v1791_v50  ;;  %v4234_v50 = vld [vmem:[%s4374_s3] ss:$0 sm:$0xff] }
 0x213   : > { %v1890_v51 = vmul.f32 %v3819_v41, %v1633_v48 }
 0x214   : > { %v2084_v34 = vadd.f32 %v3828_v47, %v1953_v3  ;;  %3011 = vmatmul.msk.bf16.gmra.mxu1 %vm989_vm0, %v2690_v46 }
 0x215   : > { %v2021_v39 = vadd.f32 %v3828_v47, %v1890_v51 }
 0x216   : > { %v2212_v56 = vmax.f32 %v2084_v34, 0.0 }
 0x217   : > { %v2149_v16 = vmax.f32 %v2021_v39, 0.0  ;;  %v1463_v17 = vpop.f32.mrf.mxu2 }
 0x218   : > { %2341 = vst.msk [vmem:[%s3410_s24 + $0x360] sm:$0xff] %vm2232_vm1, %v2212_v56  ;;  %v1793_v15 = vadd.f32 %v4127_v42, %v1463_v17  ;;  %v1306_v0 = vpop.f32.mrf.mxu0  ;;  %v1805_v20 = vpop.f32.mrf.mxu3 }
 0x219   : > { %2278 = vst.msk [vmem:[%s3410_s24 + $0x168] sm:$0xff] %vm2232_vm1, %v2149_v16  ;;  %v1636_v18 = vadd.f32 %v1635_v6, %v1306_v0  ;;  %v1642_v21 = vpop.f32.mrf.mxu1 }
 0x21a   : > { %v1954_v7 = vmul.f32 %v3819_v41, %v1793_v15 }
 0x21b   : > { %v1891_v23 = vmul.f32 %v3819_v41, %v1636_v18  ;;  %1345 = vmatmul.bf16.gmra.mxu0 %v2678_v61 }
 0x21c   : > { %v2085_v26 = vadd.f32 %v3828_v47, %v1954_v7  ;;  %1505 = vmatmul.bf16.gmra.mxu2 %v2934_v2 }
 0x21d   : > { %v2022_v10 = vadd.f32 %v3828_v47, %v1891_v23 }
 0x21e   : > { %v2213_v42 = vmax.f32 %v2085_v26, 0.0 }
 0x21f   : > { %v2150_v29 = vmax.f32 %v2022_v10, 0.0  ;;  %v1466_v32 = vpop.f32.mrf.mxu2 }
 0x220   : > { %2342 = vst.msk [vmem:[%s3410_s24 + $0x368] sm:$0xff] %vm2232_vm1, %v2213_v42  ;;  %v1796_v6 = vadd.f32 %v4149_v30, %v1466_v32  ;;  %v1308_v14 = vpop.f32.mrf.mxu0  ;;  %v1807_v58 = vpop.f32.mrf.mxu3 }
 0x221   : > { %2279 = vst.msk [vmem:[%s3410_s24 + $0x170] sm:$0xff] %vm2232_vm1, %v2150_v29  ;;  %v1638_v22 = vadd.f32 %v1637_v27, %v1308_v14  ;;  %v1645_v63 = vpop.f32.mrf.mxu1 }
 0x222   : > { %v1955_v57 = vmul.f32 %v3819_v41, %v1796_v6 }
 0x223   : > { %v1892_v11 = vmul.f32 %v3819_v41, %v1638_v22 }
 0x224   : > { %v2086_v62 = vadd.f32 %v3828_v47, %v1955_v57 }
 0x225   : > { %v2023_v36 = vadd.f32 %v3828_v47, %v1892_v11 }
 0x226   : > { %v2214_v44 = vmax.f32 %v2086_v62, 0.0 }
 0x227   : > { %v2151_v13 = vmax.f32 %v2023_v36, 0.0  ;;  %v1468_v37 = vpop.f32.mrf.mxu2 }
 0x228   : > { %2343 = vst.msk [vmem:[%s3410_s24 + $0x370] sm:$0xff] %vm2232_vm1, %v2214_v44  ;;  %v1798_v30 = vadd.f32 %v4165_v25, %v1468_v37  ;;  %v1311_v43 = vpop.f32.mrf.mxu0  ;;  %v1810_v1 = vpop.f32.mrf.mxu3 }
 0x229   : > { %2280 = vst.msk [vmem:[%s3410_s24 + $0x178] sm:$0xff] %vm2232_vm1, %v2151_v13  ;;  %v1641_v53 = vadd.f32 %v1640_v60, %v1311_v43  ;;  %v1647_v45 = vpop.f32.mrf.mxu1 }
 0x22a   : > { %v1956_v4 = vmul.f32 %v3819_v41, %v1798_v30 }
 0x22b   : > { %v1893_v31 = vmul.f32 %v3819_v41, %v1641_v53  ;;  %v4227_v41 = vld [vmem:[%s4373_s2] ss:$0 sm:$0xff] }
 0x22c   : > { %v2087_v27 = vadd.f32 %v3828_v47, %v1956_v4 }
 0x22d   : > { %v2024_v33 = vadd.f32 %v3828_v47, %v1893_v31 }
 0x22e   : > { %v2215_v52 = vmax.f32 %v2087_v27, 0.0 }
 0x22f   : > { %v2152_v55 = vmax.f32 %v2024_v33, 0.0  ;;  %v1471_v38 = vpop.f32.mrf.mxu2 }
 0x230   : > { %2344 = vst.msk [vmem:[%s3410_s24 + $0x378] sm:$0xff] %vm2232_vm1, %v2215_v52  ;;  %v1801_v25 = vadd.f32 %v1800_v5, %v1471_v38  ;;  %v1313_v49 = vpop.f32.mrf.mxu0  ;;  %v1812_v23 = vpop.f32.mrf.mxu3 }
 0x231   : > { %2281 = vst.msk [vmem:[%s3410_s24 + $0x180] sm:$0xff] %vm2232_vm1, %v2152_v55  ;;  %v1643_v40 = vadd.f32 %v1642_v21, %v1313_v49  ;;  %v1650_v35 = vpop.f32.mrf.mxu1 }
 0x232   : > { %v1957_v47 = vmul.f32 %v4227_v41, %v1801_v25 }
 0x233   : > { %v1894_v59 = vmul.f32 %v4227_v41, %v1643_v40 }
 0x234   : > { %v2088_v24 = vadd.f32 %v4234_v50, %v1957_v47 }
 0x235   : > { %v2025_v46 = vadd.f32 %v4234_v50, %v1894_v59 }
 0x236   : > { %v2216_v48 = vmax.f32 %v2088_v24, 0.0 }
 0x237   : > { %v2153_v60 = vmax.f32 %v2025_v46, 0.0  ;;  %v1473_v5 = vpop.f32.mrf.mxu2 }
 0x238   : > { %2345 = vst.msk [vmem:[%s3410_s24 + $0x380] sm:$0xff] %vm2232_vm1, %v2216_v48  ;;  %v1803_v3 = vadd.f32 %v1802_v9, %v1473_v5  ;;  %v1316_v51 = vpop.f32.mrf.mxu0  ;;  %v1815_v36 = vpop.f32.mrf.mxu3 }
 0x239   : > { %2282 = vst.msk [vmem:[%s3410_s24 + $0x188] sm:$0xff] %vm2232_vm1, %v2153_v60  ;;  %v1646_v34 = vadd.f32 %v1645_v63, %v1316_v51  ;;  %v1652_v8 = vpop.f32.mrf.mxu1 }
 0x23a   : > { %v1958_v39 = vmul.f32 %v4227_v41, %v1803_v3 }
 0x23b   : > { %v1895_v54 = vmul.f32 %v4227_v41, %v1646_v34 }
 0x23c   : > { %v2089_v19 = vadd.f32 %v4234_v50, %v1958_v39 }
 0x23d   : > { %v2026_v56 = vadd.f32 %v4234_v50, %v1895_v54 }
 0x23e   : > { %v2217_v16 = vmax.f32 %v2089_v19, 0.0 }
 0x23f   : > { %v2154_v17 = vmax.f32 %v2026_v56, 0.0  ;;  %v1476_v61 = vpop.f32.mrf.mxu2 }
 0x240   : > { %2346 = vst.msk [vmem:[%s3410_s24 + $0x388] sm:$0xff] %vm2232_vm1, %v2217_v16  ;;  %v1806_v15 = vadd.f32 %v1805_v20, %v1476_v61  ;;  %v1318_v0 = vpop.f32.mrf.mxu0  ;;  %v1817_v38 = vpop.f32.mrf.mxu3 }
 0x241   : > { %2283 = vst.msk [vmem:[%s3410_s24 + $0x190] sm:$0xff] %vm2232_vm1, %v2154_v17  ;;  %v1648_v2 = vadd.f32 %v1647_v45, %v1318_v0  ;;  %v1655_v18 = vpop.f32.mrf.mxu1 }
 0x242   : > { %v1959_v21 = vmul.f32 %v4227_v41, %v1806_v15 }
 0x243   : > { %v1896_v7 = vmul.f32 %v4227_v41, %v1648_v2 }
 0x244   : > { %v2090_v9 = vadd.f32 %v4234_v50, %v1959_v21 }
 0x245   : > { %v2027_v26 = vadd.f32 %v4234_v50, %v1896_v7 }
 0x246   : > { %v2218_v10 = vmax.f32 %v2090_v9, 0.0 }
 0x247   : > { %v2155_v42 = vmax.f32 %v2027_v26, 0.0  ;;  %v1478_v29 = vpop.f32.mrf.mxu2 }
 0x248   : > { %2347 = vst.msk [vmem:[%s3410_s24 + $0x390] sm:$0xff] %vm2232_vm1, %v2218_v10  ;;  %v1808_v32 = vadd.f32 %v1807_v58, %v1478_v29  ;;  %v1321_v6 = vpop.f32.mrf.mxu0 }
 0x249   : > { %2284 = vst.msk [vmem:[%s3410_s24 + $0x198] sm:$0xff] %vm2232_vm1, %v2155_v42  ;;  %v1651_v14 = vadd.f32 %v1650_v35, %v1321_v6  ;;  %v1657_v22 = vpop.f32.mrf.mxu1 }
 0x24a   : > { %v1960_v63 = vmul.f32 %v4227_v41, %v1808_v32 }
 0x24b   : > { %v1897_v57 = vmul.f32 %v4227_v41, %v1651_v14 }
 0x24c   : > { %v2091_v11 = vadd.f32 %v4234_v50, %v1960_v63 }
 0x24d   : > { %v2028_v62 = vadd.f32 %v4234_v50, %v1897_v57 }
 0x24e   : > { %v2219_v20 = vmax.f32 %v2091_v11, 0.0 }
 0x24f   : > { %v2156_v44 = vmax.f32 %v2028_v62, 0.0  ;;  %v1481_v13 = vpop.f32.mrf.mxu2 }
 0x250   : > { %2348 = vst.msk [vmem:[%s3410_s24 + $0x398] sm:$0xff] %vm2232_vm1, %v2219_v20  ;;  %v1811_v37 = vadd.f32 %v1810_v1, %v1481_v13  ;;  %v1323_v30 = vpop.f32.mrf.mxu0 }
 0x251   : > { %2285 = vst.msk [vmem:[%s3410_s24 + $0x1a0] sm:$0xff] %vm2232_vm1, %v2156_v44  ;;  %v1653_v43 = vadd.f32 %v1652_v8, %v1323_v30  ;;  %v1660_v53 = vpop.f32.mrf.mxu1  ;;  %v1820_v8 = vpop.f32.mrf.mxu3 }
 0x252   : > { %v1961_v45 = vmul.f32 %v4227_v41, %v1811_v37 }
 0x253   : > { %v1898_v4 = vmul.f32 %v4227_v41, %v1653_v43 }
 0x254   : > { %v2092_v31 = vadd.f32 %v4234_v50, %v1961_v45 }
 0x255   : > { %v2029_v27 = vadd.f32 %v4234_v50, %v1898_v4 }
 0x256   : > { %v2220_v33 = vmax.f32 %v2092_v31, 0.0 }
 0x257   : > { %v2157_v52 = vmax.f32 %v2029_v27, 0.0  ;;  %v1483_v55 = vpop.f32.mrf.mxu2 }
 0x258   : > { %2349 = vst.msk [vmem:[%s3410_s24 + $0x3a0] sm:$0xff] %vm2232_vm1, %v2220_v33  ;;  %v1813_v58 = vadd.f32 %v1812_v23, %v1483_v55  ;;  %v1326_v25 = vpop.f32.mrf.mxu0 }
 0x259   : > { %2286 = vst.msk [vmem:[%s3410_s24 + $0x1a8] sm:$0xff] %vm2232_vm1, %v2157_v52  ;;  %v1656_v49 = vadd.f32 %v1655_v18, %v1326_v25  ;;  %v1662_v40 = vpop.f32.mrf.mxu1  ;;  %v1822_v7 = vpop.f32.mrf.mxu3 }
 0x25a   : > { %v1962_v35 = vmul.f32 %v4227_v41, %v1813_v58 }
 0x25b   : > { %v1899_v47 = vmul.f32 %v4227_v41, %v1656_v49 }
 0x25c   : > { %v2093_v59 = vadd.f32 %v4234_v50, %v1962_v35 }
 0x25d   : > { %v2030_v24 = vadd.f32 %v4234_v50, %v1899_v47 }
 0x25e   : > { %v2221_v46 = vmax.f32 %v2093_v59, 0.0 }
 0x25f   : > { %v2158_v48 = vmax.f32 %v2030_v24, 0.0  ;;  %v1486_v60 = vpop.f32.mrf.mxu2 }
 0x260   : > { %2350 = vst.msk [vmem:[%s3410_s24 + $0x3a8] sm:$0xff] %vm2232_vm1, %v2221_v46  ;;  %v1816_v5 = vadd.f32 %v1815_v36, %v1486_v60  ;;  %v1328_v3 = vpop.f32.mrf.mxu0 }
 0x261   : > { %2287 = vst.msk [vmem:[%s3410_s24 + $0x1b0] sm:$0xff] %vm2232_vm1, %v2158_v48  ;;  %v1658_v51 = vadd.f32 %v1657_v22, %v1328_v3  ;;  %v1665_v34 = vpop.f32.mrf.mxu1  ;;  %v1825_v62 = vpop.f32.mrf.mxu3 }
 0x262   : > { %v1963_v1 = vmul.f32 %v4227_v41, %v1816_v5 }
 0x263   : > { %v1900_v39 = vmul.f32 %v4227_v41, %v1658_v51 }
 0x264   : > { %v2094_v54 = vadd.f32 %v4234_v50, %v1963_v1 }
 0x265   : > { %v2031_v19 = vadd.f32 %v4234_v50, %v1900_v39 }
 0x266   : > { %v2222_v56 = vmax.f32 %v2094_v54, 0.0 }
 0x267   : > { %v2159_v16 = vmax.f32 %v2031_v19, 0.0  ;;  %v1488_v17 = vpop.f32.mrf.mxu2 }
 0x268   : > { %2351 = vst.msk [vmem:[%s3410_s24 + $0x3b0] sm:$0xff] %vm2232_vm1, %v2222_v56  ;;  %v1818_v61 = vadd.f32 %v1817_v38, %v1488_v17  ;;  %v1331_v15 = vpop.f32.mrf.mxu0 }
 0x269   : > { %2288 = vst.msk [vmem:[%s3410_s24 + $0x1b8] sm:$0xff] %vm2232_vm1, %v2159_v16  ;;  %v1661_v0 = vadd.f32 %v1660_v53, %v1331_v15  ;;  %v1667_v2 = vpop.f32.mrf.mxu1  ;;  %v1827_v55 = vpop.f32.mrf.mxu3 }
 0x26a   : > { %v1964_v18 = vmul.f32 %v4227_v41, %v1818_v61 }
 0x26b   : > { %v1901_v21 = vmul.f32 %v4227_v41, %v1661_v0 }
 0x26c   : > { %v2095_v23 = vadd.f32 %v4234_v50, %v1964_v18 }
 0x26d   : > { %v2032_v9 = vadd.f32 %v4234_v50, %v1901_v21 }
 0x26e   : > { %v2223_v26 = vmax.f32 %v2095_v23, 0.0 }
 0x26f   : > { %v2160_v10 = vmax.f32 %v2032_v9, 0.0  ;;  %v1491_v42 = vpop.f32.mrf.mxu2 }
 0x270   : > { %2352 = vst.msk [vmem:[%s3410_s24 + $0x3b8] sm:$0xff] %vm2232_vm1, %v2223_v26  ;;  %v1821_v29 = vadd.f32 %v1820_v8, %v1491_v42  ;;  %v1333_v32 = vpop.f32.mrf.mxu0 }
 0x271   : > { %2289 = vst.msk [vmem:[%s3410_s24 + $0x1c0] sm:$0xff] %vm2232_vm1, %v2160_v10  ;;  %v1663_v6 = vadd.f32 %v1662_v40, %v1333_v32  ;;  %v1670_v14 = vpop.f32.mrf.mxu1  ;;  %v1830_v3 = vpop.f32.mrf.mxu3 }
 0x272   : > { %v1965_v22 = vmul.f32 %v4227_v41, %v1821_v29 }
 0x273   : > { %v1902_v63 = vmul.f32 %v4227_v41, %v1663_v6 }
 0x274   : > { %v2096_v57 = vadd.f32 %v4234_v50, %v1965_v22 }
 0x275   : > { %v2033_v11 = vadd.f32 %v4234_v50, %v1902_v63 }
 0x276   : > { %v2224_v36 = vmax.f32 %v2096_v57, 0.0 }
 0x277   : > { %v2161_v20 = vmax.f32 %v2033_v11, 0.0  ;;  %v1493_v44 = vpop.f32.mrf.mxu2 }
 0x278   : > { %2353 = vst.msk [vmem:[%s3410_s24 + $0x3c0] sm:$0xff] %vm2232_vm1, %v2224_v36  ;;  %v1823_v13 = vadd.f32 %v1822_v7, %v1493_v44  ;;  %v1336_v37 = vpop.f32.mrf.mxu0 }
 0x279   : > { %2290 = vst.msk [vmem:[%s3410_s24 + $0x1c8] sm:$0xff] %vm2232_vm1, %v2161_v20  ;;  %v1666_v30 = vadd.f32 %v1665_v34, %v1336_v37  ;;  %v1672_v43 = vpop.f32.mrf.mxu1  ;;  %v1832_v21 = vpop.f32.mrf.mxu3 }
 0x27a   : > { %v1966_v53 = vmul.f32 %v4227_v41, %v1823_v13 }
 0x27b   : > { %v1903_v45 = vmul.f32 %v4227_v41, %v1666_v30 }
 0x27c   : > { %v2097_v4 = vadd.f32 %v4234_v50, %v1966_v53 }
 0x27d   : > { %v2034_v31 = vadd.f32 %v4234_v50, %v1903_v45 }
 0x27e   : > { %v2225_v27 = vmax.f32 %v2097_v4, 0.0 }
 0x27f   : > { %v2162_v33 = vmax.f32 %v2034_v31, 0.0  ;;  %v1496_v52 = vpop.f32.mrf.mxu2 }
 0x280   : > { %2354 = vst.msk [vmem:[%s3410_s24 + $0x3c8] sm:$0xff] %vm2232_vm1, %v2225_v27  ;;  %v1826_v38 = vadd.f32 %v1825_v62, %v1496_v52  ;;  %v1338_v58 = vpop.f32.mrf.mxu0 }
 0x281   : > { %2291 = vst.msk [vmem:[%s3410_s24 + $0x1d0] sm:$0xff] %vm2232_vm1, %v2162_v33  ;;  %v1668_v25 = vadd.f32 %v1667_v2, %v1338_v58  ;;  %v1675_v49 = vpop.f32.mrf.mxu1  ;;  %v1835_v44 = vpop.f32.mrf.mxu3 }
 0x282   : > { %v1967_v40 = vmul.f32 %v4227_v41, %v1826_v38 }
 0x283   : > { %v1904_v35 = vmul.f32 %v4227_v41, %v1668_v25 }
 0x284   : > { %v2098_v47 = vadd.f32 %v4234_v50, %v1967_v40 }
 0x285   : > { %v2035_v59 = vadd.f32 %v4234_v50, %v1904_v35 }
 0x286   : > { %v2226_v24 = vmax.f32 %v2098_v47, 0.0 }
 0x287   : > { %v2163_v46 = vmax.f32 %v2035_v59, 0.0  ;;  %v1498_v48 = vpop.f32.mrf.mxu2 }
 0x288   : > { %2355 = vst.msk [vmem:[%s3410_s24 + $0x3d0] sm:$0xff] %vm2232_vm1, %v2226_v24  ;;  %v1828_v60 = vadd.f32 %v1827_v55, %v1498_v48  ;;  %v1341_v5 = vpop.f32.mrf.mxu0 }
 0x289   : > { %2292 = vst.msk [vmem:[%s3410_s24 + $0x1d8] sm:$0xff] %vm2232_vm1, %v2163_v46  ;;  %v1671_v51 = vadd.f32 %v1670_v14, %v1341_v5  ;;  %v1677_v34 = vpop.f32.mrf.mxu1  ;;  %v1837_v58 = vpop.f32.mrf.mxu3 }
 0x28a   : > { %v1968_v8 = vmul.f32 %v4227_v41, %v1828_v60 }
 0x28b   : > { %v1905_v1 = vmul.f32 %v4227_v41, %v1671_v51 }
 0x28c   : > { %v2099_v39 = vadd.f32 %v4234_v50, %v1968_v8 }
 0x28d   : > { %v2036_v54 = vadd.f32 %v4234_v50, %v1905_v1 }
 0x28e   : > { %v2227_v19 = vmax.f32 %v2099_v39, 0.0 }
 0x28f   : > { %v2164_v56 = vmax.f32 %v2036_v54, 0.0  ;;  %v1501_v16 = vpop.f32.mrf.mxu2 }
 0x290   : > { %2356 = vst.msk [vmem:[%s3410_s24 + $0x3d8] sm:$0xff] %vm2232_vm1, %v2227_v19  ;;  %v1831_v17 = vadd.f32 %v1830_v3, %v1501_v16  ;;  %v1343_v61 = vpop.f32.mrf.mxu0 }
 0x291   : > { %2293 = vst.msk [vmem:[%s3410_s24 + $0x1e0] sm:$0xff] %vm2232_vm1, %v2164_v56  ;;  %v1673_v15 = vadd.f32 %v1672_v43, %v1343_v61  ;;  %v1680_v0 = vpop.f32.mrf.mxu1 }
 0x292   : > { %v1969_v2 = vmul.f32 %v4227_v41, %v1831_v17  ;;  %v1681_v18 = vadd.f32 %v1680_v0, %v3412_v12 }
 0x293   : > { %v1906_v7 = vmul.f32 %v4227_v41, %v1673_v15 }
 0x294   : > { %v2100_v23 = vadd.f32 %v4234_v50, %v1969_v2  ;;  %v1909_v9 = vmul.f32 %v4227_v41, %v1681_v18 }
 0x295   : > { %v2037_v26 = vadd.f32 %v4234_v50, %v1906_v7 }
 0x296   : > { %v2228_v10 = vmax.f32 %v2100_v23, 0.0  ;;  %v2040_v42 = vadd.f32 %v4234_v50, %v1909_v9 }
 0x297   : > { %v2165_v29 = vmax.f32 %v2037_v26, 0.0  ;;  %v1503_v32 = vpop.f32.mrf.mxu2 }
 0x298   : > { %2357 = vst.msk [vmem:[%s3410_s24 + $0x3e0] sm:$0xff] %vm2232_vm1, %v2228_v10  ;;  %v2168_v6 = vmax.f32 %v2040_v42, 0.0  ;;  %v1833_v14 = vadd.f32 %v1832_v21, %v1503_v32  ;;  %v1346_v12 = vpop.f32.mrf.mxu0 }
 0x299   : > { %2294 = vst.msk [vmem:[%s3410_s24 + $0x1e8] sm:$0xff] %vm2232_vm1, %v2165_v29  ;;  %v1676_v22 = vadd.f32 %v1675_v49, %v1346_v12  ;;  %v1682_v63 = vpop.f32.mrf.mxu1 }
 0x29a   : > { %2297 = vst.msk [vmem:[%s3410_s24 + $0x200] sm:$0xff] %vm2232_vm1, %v2168_v6  ;;  %v1970_v57 = vmul.f32 %v4227_v41, %v1833_v14  ;;  %v1683_v11 = vadd.f32 %v1682_v63, %v3427_v28 }
 0x29b   : > { %v1907_v62 = vmul.f32 %v4227_v41, %v1676_v22 }
 0x29c   : > { %v2101_v36 = vadd.f32 %v4234_v50, %v1970_v57  ;;  %v1910_v20 = vmul.f32 %v4227_v41, %v1683_v11 }
 0x29d   : > { %v2038_v13 = vadd.f32 %v4234_v50, %v1907_v62 }
 0x29e   : > { %v2229_v37 = vmax.f32 %v2101_v36, 0.0  ;;  %v2041_v30 = vadd.f32 %v4234_v50, %v1910_v20 }
 0x29f   : > { %v2166_v43 = vmax.f32 %v2038_v13, 0.0  ;;  %v1506_v53 = vpop.f32.mrf.mxu2 }
 0x2a0   : > { %2358 = vst.msk [vmem:[%s3410_s24 + $0x3e8] sm:$0xff] %vm2232_vm1, %v2229_v37  ;;  %v2169_v45 = vmax.f32 %v2041_v30, 0.0  ;;  %v1836_v28 = vadd.f32 %v1835_v44, %v1506_v53  ;;  %v1348_v4 = vpop.f32.mrf.mxu0 }
 0x2a1   : > { %2295 = vst.msk [vmem:[%s3410_s24 + $0x1f0] sm:$0xff] %vm2232_vm1, %v2166_v43  ;;  %v1678_v31 = vadd.f32 %v1677_v34, %v1348_v4 }
 0x2a2   : > { %2298 = vst.msk [vmem:[%s3410_s24 + $0x208] sm:$0xff] %vm2232_vm1, %v2169_v45  ;;  %v1971_v27 = vmul.f32 %v4227_v41, %v1836_v28 }
 0x2a3   : > { %v1908_v33 = vmul.f32 %v4227_v41, %v1678_v31 }
 0x2a4   : > { %v2102_v52 = vadd.f32 %v4234_v50, %v1971_v27 }
 0x2a5   : > { %v2039_v55 = vadd.f32 %v4234_v50, %v1908_v33 }
 0x2a6   : > { %v2230_v38 = vmax.f32 %v2102_v52, 0.0 }
 0x2a7   : > { %v2167_v25 = vmax.f32 %v2039_v55, 0.0  ;;  %v1508_v49 = vpop.f32.mrf.mxu2 }
 0x2a8   : > { %2359 = vst.msk [vmem:[%s3410_s24 + $0x3f0] sm:$0xff] %vm2232_vm1, %v2230_v38  ;;  %v1838_v40 = vadd.f32 %v1837_v58, %v1508_v49 }
 0x2a9   : > { %2296 = vst.msk [vmem:[%s3410_s24 + $0x1f8] sm:$0xff] %vm2232_vm1, %v2167_v25 }
 0x2aa   : > { %v1972_v35 = vmul.f32 %v4227_v41, %v1838_v40 }
 0x2ac   : > { %v2103_v47 = vadd.f32 %v4234_v50, %v1972_v35 }
 0x2ae   : > { %v2231_v59 = vmax.f32 %v2103_v47, 0.0 }
 0x2b0   : > { %2360 = vst.msk [vmem:[%s3410_s24 + $0x3f8] sm:$0xff] %vm2232_vm1, %v2231_v59 }
 0x2b1 PF: > { %s14_s15 = sadd.s32 1, %s3214_s15  }
 0x2b2   : > { %p11_p4 = scmp.ge.s32.totalorder %s14_s15, 4  }
 0x2b4   :  { %13 = sbr.rel (!%p11_p4) target bundleno = 1 (0x1), region = 66 }

</bundles_post_ra>
